<compile_context>
chip_gen: v7x
topology: tpu7x:2x2x1
jax: 0.10.0
libtpu: 0.0.40
codegen_flags: <defaults>
</compile_context>

<pallas_src>
import functools

import jax
import jax.numpy as jnp
from jax import lax
from jax.experimental import pallas as pl
from jax.experimental.pallas import tpu as pltpu

EPS = 1e-5


# ----------------------------- fused kernel ---------------------------------
def _fused_se_bottleneck_kernel(x_ref, w1_ref, b1_ref, w2_ref, b2_ref,
                                w3_ref, b3_ref, sw1_ref, sw2_ref, o_ref,
                                *, H, W, planes, btile):
    HW = H * W
    P = planes
    M = btile * HW                                  # rows folded into matmul M

    x3 = x_ref[...]                                 # (btile, HW, Cin) f32 (residual)
    x2 = x3.reshape(M, x3.shape[-1])                # (M, Cin) — layout-free reshape

    # conv1 (1x1, BN1 scale folded into weights) + bias + ReLU -> (M, P) f32
    h1 = jnp.dot(x2.astype(jnp.bfloat16), w1_ref[...],
                 preferred_element_type=jnp.float32)
    h1 = jnp.maximum(h1 + b1_ref[...], 0.0)

    # ----- 3x3 conv (padding=1, stride=1) as 9 accumulated MXU dots ---------
    # View h1 per image and pad one zero image-row top & bottom along H.  H is
    # a tile-index axis (W rides sublanes, P rides lanes), so the concat and
    # the da=+-1 row taps below are tile-aligned (no sublane relayouts).
    h1_img = h1.reshape(btile, H, W, P)
    zrow = jnp.zeros((btile, 1, W, P), jnp.float32)
    padded = jnp.concatenate([zrow, h1_img, zrow], axis=1)  # (btile, H+2, W, P)

    # db = +-1 column taps: one sublane roll (XLU) + edge mask each.
    col = lax.broadcasted_iota(jnp.int32, padded.shape, 2)
    # left[.., j, :]  = padded[.., j-1, :]   (column 0 invalid)
    left = jnp.where(col >= 1, pltpu.roll(padded, 1, axis=2), 0.0)
    # right[.., j, :] = padded[.., j+1, :]   (column W-1 invalid)
    right = jnp.where(col <= W - 2, pltpu.roll(padded, W - 1, axis=2), 0.0)
    shifted = {-1: left, 0: padded, 1: right}

    h2 = None
    t = 0
    for da in (-1, 0, 1):
        for db in (-1, 0, 1):
            piece = shifted[db][:, 1 + da:1 + da + H]        # (btile, H, W, P)
            piece = piece.reshape(M, P).astype(jnp.bfloat16)
            d = jnp.dot(piece, w2_ref[t], preferred_element_type=jnp.float32)
            h2 = d if h2 is None else h2 + d
            t += 1
    h2 = jnp.maximum(h2 + b2_ref[...], 0.0)                  # (M, P)

    # conv3 (1x1, BN3 folded) + bias -> (M, C4) f32
    h3 = jnp.dot(h2.astype(jnp.bfloat16), w3_ref[...],
                 preferred_element_type=jnp.float32) + b3_ref[...]
    C4 = h3.shape[-1]

    # ----- SE: per-image global average pool + 2-layer MLP + sigmoid gate ---
    h3_img = h3.reshape(btile, HW, C4)
    pooled = jnp.mean(h3_img, axis=1)                        # (btile, C4)
    # Tiny matmuls (M = btile, K <= 128): batched over the tile; kept f32 for
    # accuracy margin since their cost is negligible.
    y = jnp.maximum(jnp.dot(pooled, sw1_ref[...],
                            preferred_element_type=jnp.float32), 0.0)
    z = jnp.dot(y, sw2_ref[...], preferred_element_type=jnp.float32)
    gate = 1.0 / (1.0 + jnp.exp(-z))                         # exact sigmoid

    # scale, residual add, final ReLU (downsample=None => residual = x)
    o_ref[...] = jnp.maximum(h3_img * gate[:, None, :] + x3, 0.0)


# ------------------------------- wrappers ------------------------------------
def _pick_batch_tile(n, hw, target_rows=256):
    """B_tile so that B_tile*HW ~= target_rows, with >=2 grid steps when N>=2
    (so both v7x TensorCores get work), and B_tile | N."""
    btile = max(1, min(n, target_rows // max(hw, 1)))
    if n >= 2:
        btile = max(1, min(btile, n // 2))
    while n % btile:
        btile -= 1
    return btile


def se_bottleneck_forward_nhwc(x_nhwc, params):
    """Preferred entry point: NHWC activations (no wrapper transposes)."""
    n, h, w, cin = x_nhwc.shape
    planes = params["w1"].shape[1]
    c4 = params["w3"].shape[1]
    assert cin == c4, "downsample=None requires inplanes == planes * 4"
    hw = h * w

    btile = _pick_batch_tile(n, hw)
    grid = n // btile

    x = x_nhwc.reshape(n, hw, cin)          # metadata-only reshape

    kernel = functools.partial(_fused_se_bottleneck_kernel,
                               H=h, W=w, planes=planes, btile=btile)

    def full(a):
        return pl.BlockSpec(a.shape, lambda b: (0,) * a.ndim)

    out = pl.pallas_call(
        kernel,
        out_shape=jax.ShapeDtypeStruct((n, hw, c4), jnp.float32),
        grid=(grid,),
        in_specs=[
            pl.BlockSpec((btile, hw, cin), lambda b: (b, 0, 0)),
            full(params["w1"]), full(params["b1"]),
            full(params["w2"]), full(params["b2"]),
            full(params["w3"]), full(params["b3"]),
            full(params["se_w1"]), full(params["se_w2"]),
        ],
        out_specs=pl.BlockSpec((btile, hw, c4), lambda b: (b, 0, 0)),
        compiler_params=pltpu.CompilerParams(
            dimension_semantics=("parallel",)),
    )(x, params["w1"], params["b1"], params["w2"], params["b2"],
      params["w3"], params["b3"], params["se_w1"], params["se_w2"])

    return out.reshape(n, h, w, c4)


def se_bottleneck_forward(x_nchw, params):
    """PyTorch-convention NCHW wrapper (two extra XLA transposes; prefer the
    NHWC entry point on the hot path)."""
    x_nhwc = jnp.transpose(x_nchw, (0, 2, 3, 1))
    out = se_bottleneck_forward_nhwc(x_nhwc, params)
    return jnp.transpose(out, (0, 3, 1, 2))


# ---------------------- pure-JAX reference (NCHW, f32) -----------------------
def reference_forward(x, p):
    def bn(t, stats):
        g, b, m, v = stats
        inv = g / jnp.sqrt(v + EPS)
        return t * inv[None, :, None, None] + (b - m * inv)[None, :, None, None]

    dn = ("NCHW", "OIHW", "NCHW")
    hi = lax.Precision.HIGHEST
    out = lax.conv_general_dilated(x, p["w1_oihw"], (1, 1), "VALID",
                                   dimension_numbers=dn, precision=hi)
    out = jax.nn.relu(bn(out, p["bn1"]))
    out = lax.conv_general_dilated(out, p["w2_oihw"], (1, 1),
                                   ((1, 1), (1, 1)), dimension_numbers=dn,
                                   precision=hi)
    out = jax.nn.relu(bn(out, p["bn2"]))
    out = lax.conv_general_dilated(out, p["w3_oihw"], (1, 1), "VALID",
                                   dimension_numbers=dn, precision=hi)
    out = bn(out, p["bn3"])
    y = jnp.mean(out, axis=(2, 3))
    y = jax.nn.relu(jnp.dot(y, p["fc1"].T, precision=hi))
    y = jax.nn.sigmoid(jnp.dot(y, p["fc2"].T, precision=hi))
    out = out * y[:, :, None, None]
    out = out + x
    return jax.nn.relu(out)


if __name__ == "__main__":
    # SEBottleneck(inplanes=128, planes=32): residual works without downsample.
    inplanes, planes, reduction = 128, 32, 16
    N, H, W = 8, 8, 8                      # N=8 -> B_tile=4, grid=2, M=256
    C4 = planes * 4                        # 128 (lane-dense output)
    Cr = C4 // reduction                   # 8

    key = jax.random.PRNGKey(0)
    ks = jax.random.split(key, 10)

    w1_oihw = 0.1 * jax.random.normal(ks[0], (planes, inplanes, 1, 1), jnp.float32)
    w2_oihw = 0.1 * jax.random.normal(ks[1], (planes, planes, 3, 3), jnp.float32)
    w3_oihw = 0.1 * jax.random.normal(ks[2], (C4, planes, 1, 1), jnp.float32)
    fc1 = 0.2 * jax.random.normal(ks[3], (Cr, C4), jnp.float32)   # Linear(out,in)
    fc2 = 0.2 * jax.random.normal(ks[4], (C4, Cr), jnp.float32)

    def bn_params(k, c):
        k1, k2, k3, k4 = jax.random.split(k, 4)
        gamma = 1.0 + 0.1 * jax.random.normal(k1, (c,), jnp.float32)
        beta = 0.1 * jax.random.normal(k2, (c,), jnp.float32)
        mean = 0.1 * jax.random.normal(k3, (c,), jnp.float32)
        var = jax.random.uniform(k4, (c,), jnp.float32, 0.5, 1.5)
        return gamma, beta, mean, var

    bn1 = bn_params(ks[5], planes)
    bn2 = bn_params(ks[6], planes)
    bn3 = bn_params(ks[7], C4)
    x_nhwc = jax.random.normal(ks[8], (N, H, W, inplanes), jnp.float32)
    x_nchw = jnp.transpose(x_nhwc, (0, 3, 1, 2))

    def fold(stats):
        g, b, m, v = stats
        s = g / jnp.sqrt(v + EPS)
        return s, b - m * s

    s1, bb1 = fold(bn1)
    s2, bb2 = fold(bn2)
    s3, bb3 = fold(bn3)

    # Fold BN scale into conv weights host-side; cast matmul operands to bf16.
    w1 = (jnp.transpose(w1_oihw[:, :, 0, 0]) * s1[None, :]).astype(jnp.bfloat16)
    w2_taps = jnp.transpose(w2_oihw, (2, 3, 1, 0)) * s2[None, None, None, :]
    w2 = w2_taps.reshape(9, planes, planes).astype(jnp.bfloat16)   # t = (da+1)*3+(db+1)
    w3 = (jnp.transpose(w3_oihw[:, :, 0, 0]) * s3[None, :]).astype(jnp.bfloat16)

    params = dict(
        w1=w1, b1=bb1.reshape(1, -1),
        w2=w2, b2=bb2.reshape(1, -1),
        w3=w3, b3=bb3.reshape(1, -1),
        se_w1=fc1.T,                     # (C4, Cr) f32
        se_w2=fc2.T,                     # (Cr, C4) f32
    )

    out_nhwc = jax.block_until_ready(se_bottleneck_forward_nhwc(x_nhwc, params))

    ref_nchw = reference_forward(x_nchw, dict(w1_oihw=w1_oihw, w2_oihw=w2_oihw,
                                              w3_oihw=w3_oihw, fc1=fc1, fc2=fc2,
                                              bn1=bn1, bn2=bn2, bn3=bn3))
    ref_nhwc = jnp.transpose(ref_nchw, (0, 2, 3, 1))
    assert out_nhwc.shape == ref_nhwc.shape == (N, H, W, C4)
    max_err = float(jnp.max(jnp.abs(out_nhwc - ref_nhwc)))
    # bf16 matmul operands (f32 accumulate) => slightly relaxed tolerance.
    assert jnp.allclose(out_nhwc, ref_nhwc, atol=2e-2, rtol=2e-2), max_err

    # PyTorch-convention NCHW entry-point parity check (same compiled kernel).
    out_nchw = jax.block_until_ready(se_bottleneck_forward(x_nchw, params))
    assert jnp.allclose(out_nchw, ref_nchw, atol=2e-2, rtol=2e-2)

    print("KERNEL_OK")
</pallas_src>

<mosaic_0001>
module attributes {stable_mosaic.version = 11 : i64} {
  func.func @_fused_se_bottleneck_kernel(%arg0: i32, %arg1: memref<4x64x128xf32, #tpu.memory_space<vmem>>, %arg2: memref<128x32xbf16, #tpu.memory_space<vmem>>, %arg3: memref<1x32xf32, #tpu.memory_space<vmem>>, %arg4: memref<9x32x32xbf16, #tpu.memory_space<vmem>>, %arg5: memref<1x32xf32, #tpu.memory_space<vmem>>, %arg6: memref<32x128xbf16, #tpu.memory_space<vmem>>, %arg7: memref<1x128xf32, #tpu.memory_space<vmem>>, %arg8: memref<128x8xf32, #tpu.memory_space<vmem>>, %arg9: memref<8x128xf32, #tpu.memory_space<vmem>>, %arg10: memref<4x64x128xf32, #tpu.memory_space<vmem>>) attributes {dimension_semantics = [#tpu.dimension_semantics<parallel>], iteration_bounds = array<i64: 2>, scalar_prefetch = 0 : i64, scratch_operands = 0 : i64, tpu.core_type = #tpu.core_type<tc>, window_params = [{transform_indices = @transform_0, window_bounds = array<i64: 4, 64, 128>}, {pipeline_mode = #tpu.pipeline_mode<synchronous>, transform_indices = @transform_1, window_bounds = array<i64: 128, 32>}, {pipeline_mode = #tpu.pipeline_mode<synchronous>, transform_indices = @transform_2, window_bounds = array<i64: 1, 32>}, {pipeline_mode = #tpu.pipeline_mode<synchronous>, transform_indices = @transform_3, window_bounds = array<i64: 9, 32, 32>}, {pipeline_mode = #tpu.pipeline_mode<synchronous>, transform_indices = @transform_4, window_bounds = array<i64: 1, 32>}, {pipeline_mode = #tpu.pipeline_mode<synchronous>, transform_indices = @transform_5, window_bounds = array<i64: 32, 128>}, {pipeline_mode = #tpu.pipeline_mode<synchronous>, transform_indices = @transform_6, window_bounds = array<i64: 1, 128>}, {pipeline_mode = #tpu.pipeline_mode<synchronous>, transform_indices = @transform_7, window_bounds = array<i64: 128, 8>}, {pipeline_mode = #tpu.pipeline_mode<synchronous>, transform_indices = @transform_8, window_bounds = array<i64: 8, 128>}, {transform_indices = @transform_9, window_bounds = array<i64: 4, 64, 128>}]} {
    %c0 = arith.constant 0 : index
    %c0_0 = arith.constant 0 : index
    %c0_1 = arith.constant 0 : index
    %0 = vector.load %arg1[%c0, %c0_0, %c0_1] : memref<4x64x128xf32, #tpu.memory_space<vmem>>, vector<4x64x128xf32>
    %1 = vector.shape_cast %0 : vector<4x64x128xf32> to vector<256x128xf32>
    %2 = arith.truncf %1 : vector<256x128xf32> to vector<256x128xbf16>
    %c0_2 = arith.constant 0 : index
    %c0_3 = arith.constant 0 : index
    %3 = vector.load %arg2[%c0_2, %c0_3] : memref<128x32xbf16, #tpu.memory_space<vmem>>, vector<128x32xbf16>
    %cst = arith.constant dense<0.000000e+00> : vector<256x32xf32>
    %4 = tpu.matmul %2, %3, %cst {dimension_numbers = #tpu.dot_dimension_numbers<[1], [0], [0], [1], [0, 0, 1, 1], [], []>} : vector<256x128xbf16>, vector<128x32xbf16>, vector<256x32xf32> -> vector<256x32xf32>
    %c0_4 = arith.constant 0 : index
    %c0_5 = arith.constant 0 : index
    %5 = vector.load %arg3[%c0_4, %c0_5] : memref<1x32xf32, #tpu.memory_space<vmem>>, vector<1x32xf32>
    %6 = vector.broadcast %5 : vector<1x32xf32> to vector<256x32xf32>
    %7 = arith.addf %4, %6 : vector<256x32xf32>
    %cst_6 = arith.constant 0.000000e+00 : f32
    %8 = vector.broadcast %cst_6 : f32 to vector<256x32xf32>
    %9 = arith.maximumf %7, %8 : vector<256x32xf32>
    %10 = vector.shape_cast %9 : vector<256x32xf32> to vector<4x8x8x32xf32>
    %cst_7 = arith.constant 0.000000e+00 : f32
    %11 = vector.broadcast %cst_7 : f32 to vector<4x1x8x32xf32>
    %12 = tpu.concatenate %11, %10, %11 in 1 : vector<4x1x8x32xf32>, vector<4x8x8x32xf32>, vector<4x1x8x32xf32> -> vector<4x10x8x32xf32>
    %13 = tpu.iota {dimensions = array<i32: 2>} : vector<4x10x8x32xi32>
    %c1_i32 = arith.constant 1 : i32
    %14 = vector.broadcast %c1_i32 : i32 to vector<4x10x8x32xi32>
    %15 = arith.cmpi sge, %13, %14 : vector<4x10x8x32xi32>
    %c1_i32_8 = arith.constant 1 : i32
    %16 = tpu.dynamic_rotate %12 by %c1_i32_8 dim 2 : vector<4x10x8x32xf32>, i32 -> vector<4x10x8x32xf32>
    %cst_9 = arith.constant 0.000000e+00 : f32
    %17 = vector.broadcast %cst_9 : f32 to vector<4x10x8x32xf32>
    %18 = arith.select %15, %16, %17 : vector<4x10x8x32xi1>, vector<4x10x8x32xf32>
    %c6_i32 = arith.constant 6 : i32
    %19 = vector.broadcast %c6_i32 : i32 to vector<4x10x8x32xi32>
    %20 = arith.cmpi sle, %13, %19 : vector<4x10x8x32xi32>
    %c7_i32 = arith.constant 7 : i32
    %21 = tpu.dynamic_rotate %12 by %c7_i32 dim 2 : vector<4x10x8x32xf32>, i32 -> vector<4x10x8x32xf32>
    %cst_10 = arith.constant 0.000000e+00 : f32
    %22 = vector.broadcast %cst_10 : f32 to vector<4x10x8x32xf32>
    %23 = arith.select %20, %21, %22 : vector<4x10x8x32xi1>, vector<4x10x8x32xf32>
    %24 = vector.extract_strided_slice %18 {offsets = [0, 0, 0, 0], sizes = [4, 8, 8, 32], strides = [1, 1, 1, 1]} : vector<4x10x8x32xf32> to vector<4x8x8x32xf32>
    %25 = vector.shape_cast %24 : vector<4x8x8x32xf32> to vector<256x32xf32>
    %26 = arith.truncf %25 : vector<256x32xf32> to vector<256x32xbf16>
    %c0_11 = arith.constant 0 : index
    %c0_12 = arith.constant 0 : index
    %c0_13 = arith.constant 0 : index
    %27 = vector.load %arg4[%c0_11, %c0_12, %c0_13] : memref<9x32x32xbf16, #tpu.memory_space<vmem>>, vector<1x32x32xbf16>
    %28 = vector.shape_cast %27 : vector<1x32x32xbf16> to vector<32x32xbf16>
    %cst_14 = arith.constant dense<0.000000e+00> : vector<256x32xf32>
    %29 = tpu.matmul %26, %28, %cst_14 {dimension_numbers = #tpu.dot_dimension_numbers<[1], [0], [0], [1], [0, 0, 1, 1], [], []>} : vector<256x32xbf16>, vector<32x32xbf16>, vector<256x32xf32> -> vector<256x32xf32>
    %30 = vector.extract_strided_slice %12 {offsets = [0, 0, 0, 0], sizes = [4, 8, 8, 32], strides = [1, 1, 1, 1]} : vector<4x10x8x32xf32> to vector<4x8x8x32xf32>
    %31 = vector.shape_cast %30 : vector<4x8x8x32xf32> to vector<256x32xf32>
    %32 = arith.truncf %31 : vector<256x32xf32> to vector<256x32xbf16>
    %c1 = arith.constant 1 : index
    %c0_15 = arith.constant 0 : index
    %c0_16 = arith.constant 0 : index
    %33 = vector.load %arg4[%c1, %c0_15, %c0_16] : memref<9x32x32xbf16, #tpu.memory_space<vmem>>, vector<1x32x32xbf16>
    %34 = vector.shape_cast %33 : vector<1x32x32xbf16> to vector<32x32xbf16>
    %cst_17 = arith.constant dense<0.000000e+00> : vector<256x32xf32>
    %35 = tpu.matmul %32, %34, %cst_17 {dimension_numbers = #tpu.dot_dimension_numbers<[1], [0], [0], [1], [0, 0, 1, 1], [], []>} : vector<256x32xbf16>, vector<32x32xbf16>, vector<256x32xf32> -> vector<256x32xf32>
    %36 = arith.addf %29, %35 : vector<256x32xf32>
    %37 = vector.extract_strided_slice %23 {offsets = [0, 0, 0, 0], sizes = [4, 8, 8, 32], strides = [1, 1, 1, 1]} : vector<4x10x8x32xf32> to vector<4x8x8x32xf32>
    %38 = vector.shape_cast %37 : vector<4x8x8x32xf32> to vector<256x32xf32>
    %39 = arith.truncf %38 : vector<256x32xf32> to vector<256x32xbf16>
    %c2 = arith.constant 2 : index
    %c0_18 = arith.constant 0 : index
    %c0_19 = arith.constant 0 : index
    %40 = vector.load %arg4[%c2, %c0_18, %c0_19] : memref<9x32x32xbf16, #tpu.memory_space<vmem>>, vector<1x32x32xbf16>
    %41 = vector.shape_cast %40 : vector<1x32x32xbf16> to vector<32x32xbf16>
    %cst_20 = arith.constant dense<0.000000e+00> : vector<256x32xf32>
    %42 = tpu.matmul %39, %41, %cst_20 {dimension_numbers = #tpu.dot_dimension_numbers<[1], [0], [0], [1], [0, 0, 1, 1], [], []>} : vector<256x32xbf16>, vector<32x32xbf16>, vector<256x32xf32> -> vector<256x32xf32>
    %43 = arith.addf %36, %42 : vector<256x32xf32>
    %44 = vector.extract_strided_slice %18 {offsets = [0, 1, 0, 0], sizes = [4, 8, 8, 32], strides = [1, 1, 1, 1]} : vector<4x10x8x32xf32> to vector<4x8x8x32xf32>
    %45 = vector.shape_cast %44 : vector<4x8x8x32xf32> to vector<256x32xf32>
    %46 = arith.truncf %45 : vector<256x32xf32> to vector<256x32xbf16>
    %c3 = arith.constant 3 : index
    %c0_21 = arith.constant 0 : index
    %c0_22 = arith.constant 0 : index
    %47 = vector.load %arg4[%c3, %c0_21, %c0_22] : memref<9x32x32xbf16, #tpu.memory_space<vmem>>, vector<1x32x32xbf16>
    %48 = vector.shape_cast %47 : vector<1x32x32xbf16> to vector<32x32xbf16>
    %cst_23 = arith.constant dense<0.000000e+00> : vector<256x32xf32>
    %49 = tpu.matmul %46, %48, %cst_23 {dimension_numbers = #tpu.dot_dimension_numbers<[1], [0], [0], [1], [0, 0, 1, 1], [], []>} : vector<256x32xbf16>, vector<32x32xbf16>, vector<256x32xf32> -> vector<256x32xf32>
    %50 = arith.addf %43, %49 : vector<256x32xf32>
    %51 = vector.extract_strided_slice %12 {offsets = [0, 1, 0, 0], sizes = [4, 8, 8, 32], strides = [1, 1, 1, 1]} : vector<4x10x8x32xf32> to vector<4x8x8x32xf32>
    %52 = vector.shape_cast %51 : vector<4x8x8x32xf32> to vector<256x32xf32>
    %53 = arith.truncf %52 : vector<256x32xf32> to vector<256x32xbf16>
    %c4 = arith.constant 4 : index
    %c0_24 = arith.constant 0 : index
    %c0_25 = arith.constant 0 : index
    %54 = vector.load %arg4[%c4, %c0_24, %c0_25] : memref<9x32x32xbf16, #tpu.memory_space<vmem>>, vector<1x32x32xbf16>
    %55 = vector.shape_cast %54 : vector<1x32x32xbf16> to vector<32x32xbf16>
    %cst_26 = arith.constant dense<0.000000e+00> : vector<256x32xf32>
    %56 = tpu.matmul %53, %55, %cst_26 {dimension_numbers = #tpu.dot_dimension_numbers<[1], [0], [0], [1], [0, 0, 1, 1], [], []>} : vector<256x32xbf16>, vector<32x32xbf16>, vector<256x32xf32> -> vector<256x32xf32>
    %57 = arith.addf %50, %56 : vector<256x32xf32>
    %58 = vector.extract_strided_slice %23 {offsets = [0, 1, 0, 0], sizes = [4, 8, 8, 32], strides = [1, 1, 1, 1]} : vector<4x10x8x32xf32> to vector<4x8x8x32xf32>
    %59 = vector.shape_cast %58 : vector<4x8x8x32xf32> to vector<256x32xf32>
    %60 = arith.truncf %59 : vector<256x32xf32> to vector<256x32xbf16>
    %c5 = arith.constant 5 : index
    %c0_27 = arith.constant 0 : index
    %c0_28 = arith.constant 0 : index
    %61 = vector.load %arg4[%c5, %c0_27, %c0_28] : memref<9x32x32xbf16, #tpu.memory_space<vmem>>, vector<1x32x32xbf16>
    %62 = vector.shape_cast %61 : vector<1x32x32xbf16> to vector<32x32xbf16>
    %cst_29 = arith.constant dense<0.000000e+00> : vector<256x32xf32>
    %63 = tpu.matmul %60, %62, %cst_29 {dimension_numbers = #tpu.dot_dimension_numbers<[1], [0], [0], [1], [0, 0, 1, 1], [], []>} : vector<256x32xbf16>, vector<32x32xbf16>, vector<256x32xf32> -> vector<256x32xf32>
    %64 = arith.addf %57, %63 : vector<256x32xf32>
    %65 = vector.extract_strided_slice %18 {offsets = [0, 2, 0, 0], sizes = [4, 8, 8, 32], strides = [1, 1, 1, 1]} : vector<4x10x8x32xf32> to vector<4x8x8x32xf32>
    %66 = vector.shape_cast %65 : vector<4x8x8x32xf32> to vector<256x32xf32>
    %67 = arith.truncf %66 : vector<256x32xf32> to vector<256x32xbf16>
    %c6 = arith.constant 6 : index
    %c0_30 = arith.constant 0 : index
    %c0_31 = arith.constant 0 : index
    %68 = vector.load %arg4[%c6, %c0_30, %c0_31] : memref<9x32x32xbf16, #tpu.memory_space<vmem>>, vector<1x32x32xbf16>
    %69 = vector.shape_cast %68 : vector<1x32x32xbf16> to vector<32x32xbf16>
    %cst_32 = arith.constant dense<0.000000e+00> : vector<256x32xf32>
    %70 = tpu.matmul %67, %69, %cst_32 {dimension_numbers = #tpu.dot_dimension_numbers<[1], [0], [0], [1], [0, 0, 1, 1], [], []>} : vector<256x32xbf16>, vector<32x32xbf16>, vector<256x32xf32> -> vector<256x32xf32>
    %71 = arith.addf %64, %70 : vector<256x32xf32>
    %72 = vector.extract_strided_slice %12 {offsets = [0, 2, 0, 0], sizes = [4, 8, 8, 32], strides = [1, 1, 1, 1]} : vector<4x10x8x32xf32> to vector<4x8x8x32xf32>
    %73 = vector.shape_cast %72 : vector<4x8x8x32xf32> to vector<256x32xf32>
    %74 = arith.truncf %73 : vector<256x32xf32> to vector<256x32xbf16>
    %c7 = arith.constant 7 : index
    %c0_33 = arith.constant 0 : index
    %c0_34 = arith.constant 0 : index
    %75 = vector.load %arg4[%c7, %c0_33, %c0_34] : memref<9x32x32xbf16, #tpu.memory_space<vmem>>, vector<1x32x32xbf16>
    %76 = vector.shape_cast %75 : vector<1x32x32xbf16> to vector<32x32xbf16>
    %cst_35 = arith.constant dense<0.000000e+00> : vector<256x32xf32>
    %77 = tpu.matmul %74, %76, %cst_35 {dimension_numbers = #tpu.dot_dimension_numbers<[1], [0], [0], [1], [0, 0, 1, 1], [], []>} : vector<256x32xbf16>, vector<32x32xbf16>, vector<256x32xf32> -> vector<256x32xf32>
    %78 = arith.addf %71, %77 : vector<256x32xf32>
    %79 = vector.extract_strided_slice %23 {offsets = [0, 2, 0, 0], sizes = [4, 8, 8, 32], strides = [1, 1, 1, 1]} : vector<4x10x8x32xf32> to vector<4x8x8x32xf32>
    %80 = vector.shape_cast %79 : vector<4x8x8x32xf32> to vector<256x32xf32>
    %81 = arith.truncf %80 : vector<256x32xf32> to vector<256x32xbf16>
    %c8 = arith.constant 8 : index
    %c0_36 = arith.constant 0 : index
    %c0_37 = arith.constant 0 : index
    %82 = vector.load %arg4[%c8, %c0_36, %c0_37] : memref<9x32x32xbf16, #tpu.memory_space<vmem>>, vector<1x32x32xbf16>
    %83 = vector.shape_cast %82 : vector<1x32x32xbf16> to vector<32x32xbf16>
    %cst_38 = arith.constant dense<0.000000e+00> : vector<256x32xf32>
    %84 = tpu.matmul %81, %83, %cst_38 {dimension_numbers = #tpu.dot_dimension_numbers<[1], [0], [0], [1], [0, 0, 1, 1], [], []>} : vector<256x32xbf16>, vector<32x32xbf16>, vector<256x32xf32> -> vector<256x32xf32>
    %85 = arith.addf %78, %84 : vector<256x32xf32>
    %c0_39 = arith.constant 0 : index
    %c0_40 = arith.constant 0 : index
    %86 = vector.load %arg5[%c0_39, %c0_40] : memref<1x32xf32, #tpu.memory_space<vmem>>, vector<1x32xf32>
    %87 = vector.broadcast %86 : vector<1x32xf32> to vector<256x32xf32>
    %88 = arith.addf %85, %87 : vector<256x32xf32>
    %cst_41 = arith.constant 0.000000e+00 : f32
    %89 = vector.broadcast %cst_41 : f32 to vector<256x32xf32>
    %90 = arith.maximumf %88, %89 : vector<256x32xf32>
    %91 = arith.truncf %90 : vector<256x32xf32> to vector<256x32xbf16>
    %c0_42 = arith.constant 0 : index
    %c0_43 = arith.constant 0 : index
    %92 = vector.load %arg6[%c0_42, %c0_43] : memref<32x128xbf16, #tpu.memory_space<vmem>>, vector<32x128xbf16>
    %cst_44 = arith.constant dense<0.000000e+00> : vector<256x128xf32>
    %93 = tpu.matmul %91, %92, %cst_44 {dimension_numbers = #tpu.dot_dimension_numbers<[1], [0], [0], [1], [0, 0, 1, 1], [], []>} : vector<256x32xbf16>, vector<32x128xbf16>, vector<256x128xf32> -> vector<256x128xf32>
    %c0_45 = arith.constant 0 : index
    %c0_46 = arith.constant 0 : index
    %94 = vector.load %arg7[%c0_45, %c0_46] : memref<1x128xf32, #tpu.memory_space<vmem>>, vector<1x128xf32>
    %95 = vector.broadcast %94 : vector<1x128xf32> to vector<256x128xf32>
    %96 = arith.addf %93, %95 : vector<256x128xf32>
    %97 = vector.shape_cast %96 : vector<256x128xf32> to vector<4x64x128xf32>
    %cst_47 = arith.constant dense<0.000000e+00> : vector<4x128xf32>
    %98 = vector.multi_reduction <add>, %97, %cst_47 [1] : vector<4x64x128xf32> to vector<4x128xf32>
    %cst_48 = arith.constant 6.400000e+01 : f32
    %99 = vector.broadcast %cst_48 : f32 to vector<4x128xf32>
    %100 = arith.divf %98, %99 : vector<4x128xf32>
    %c0_49 = arith.constant 0 : index
    %c0_50 = arith.constant 0 : index
    %101 = vector.load %arg8[%c0_49, %c0_50] : memref<128x8xf32, #tpu.memory_space<vmem>>, vector<128x8xf32>
    %cst_51 = arith.constant dense<0.000000e+00> : vector<4x8xf32>
    %102 = tpu.matmul %100, %101, %cst_51 {dimension_numbers = #tpu.dot_dimension_numbers<[1], [0], [0], [1], [0, 0, 1, 1], [], []>} : vector<4x128xf32>, vector<128x8xf32>, vector<4x8xf32> -> vector<4x8xf32>
    %cst_52 = arith.constant 0.000000e+00 : f32
    %103 = vector.broadcast %cst_52 : f32 to vector<4x8xf32>
    %104 = arith.maximumf %102, %103 : vector<4x8xf32>
    %c0_53 = arith.constant 0 : index
    %c0_54 = arith.constant 0 : index
    %105 = vector.load %arg9[%c0_53, %c0_54] : memref<8x128xf32, #tpu.memory_space<vmem>>, vector<8x128xf32>
    %cst_55 = arith.constant dense<0.000000e+00> : vector<4x128xf32>
    %106 = tpu.matmul %104, %105, %cst_55 {dimension_numbers = #tpu.dot_dimension_numbers<[1], [0], [0], [1], [0, 0, 1, 1], [], []>} : vector<4x8xf32>, vector<8x128xf32>, vector<4x128xf32> -> vector<4x128xf32>
    %cst_56 = arith.constant 0.000000e+00 : f32
    %107 = vector.broadcast %cst_56 : f32 to vector<4x128xf32>
    %108 = arith.subf %107, %106 : vector<4x128xf32>
    %109 = math.exp %108 : vector<4x128xf32>
    %cst_57 = arith.constant 1.000000e+00 : f32
    %110 = vector.broadcast %cst_57 : f32 to vector<4x128xf32>
    %111 = arith.addf %110, %109 : vector<4x128xf32>
    %cst_58 = arith.constant 1.000000e+00 : f32
    %112 = vector.broadcast %cst_58 : f32 to vector<4x128xf32>
    %113 = arith.divf %112, %111 : vector<4x128xf32>
    %114 = vector.shape_cast %113 : vector<4x128xf32> to vector<4x1x128xf32>
    %115 = vector.broadcast %114 : vector<4x1x128xf32> to vector<4x64x128xf32>
    %116 = arith.mulf %97, %115 : vector<4x64x128xf32>
    %117 = arith.addf %116, %0 : vector<4x64x128xf32>
    %cst_59 = arith.constant 0.000000e+00 : f32
    %118 = vector.broadcast %cst_59 : f32 to vector<4x64x128xf32>
    %119 = arith.maximumf %117, %118 : vector<4x64x128xf32>
    %c0_60 = arith.constant 0 : index
    %c0_61 = arith.constant 0 : index
    %c0_62 = arith.constant 0 : index
    %120 = vector.load %arg10[%c0_60, %c0_61, %c0_62] : memref<4x64x128xf32, #tpu.memory_space<vmem>>, vector<4x64x128xf32>
    tpu.vector_store %arg10[%c0_60, %c0_61, %c0_62], %119 {strides = array<i32>} : memref<4x64x128xf32, #tpu.memory_space<vmem>>, vector<4x64x128xf32>,
    return
  }
  func.func @transform_0(%arg0: i32) -> (i32, i32, i32) {
    %c0_i32 = arith.constant 0 : i32
    %c0_i32_0 = arith.constant 0 : i32
    %c0_i32_1 = arith.constant 0 : i32
    return %arg0, %c0_i32, %c0_i32_0 : i32, i32, i32
  }
  func.func @transform_1(%arg0: i32) -> (i32, i32) {
    %c0_i32 = arith.constant 0 : i32
    %c0_i32_0 = arith.constant 0 : i32
    %c0_i32_1 = arith.constant 0 : i32
    return %c0_i32, %c0_i32_0 : i32, i32
  }
  func.func @transform_2(%arg0: i32) -> (i32, i32) {
    %c0_i32 = arith.constant 0 : i32
    %c0_i32_0 = arith.constant 0 : i32
    %c0_i32_1 = arith.constant 0 : i32
    return %c0_i32, %c0_i32_0 : i32, i32
  }
  func.func @transform_3(%arg0: i32) -> (i32, i32, i32) {
    %c0_i32 = arith.constant 0 : i32
    %c0_i32_0 = arith.constant 0 : i32
    %c0_i32_1 = arith.constant 0 : i32
    %c0_i32_2 = arith.constant 0 : i32
    return %c0_i32, %c0_i32_0, %c0_i32_1 : i32, i32, i32
  }
  func.func @transform_4(%arg0: i32) -> (i32, i32) {
    %c0_i32 = arith.constant 0 : i32
    %c0_i32_0 = arith.constant 0 : i32
    %c0_i32_1 = arith.constant 0 : i32
    return %c0_i32, %c0_i32_0 : i32, i32
  }
  func.func @transform_5(%arg0: i32) -> (i32, i32) {
    %c0_i32 = arith.constant 0 : i32
    %c0_i32_0 = arith.constant 0 : i32
    %c0_i32_1 = arith.constant 0 : i32
    return %c0_i32, %c0_i32_0 : i32, i32
  }
  func.func @transform_6(%arg0: i32) -> (i32, i32) {
    %c0_i32 = arith.constant 0 : i32
    %c0_i32_0 = arith.constant 0 : i32
    %c0_i32_1 = arith.constant 0 : i32
    return %c0_i32, %c0_i32_0 : i32, i32
  }
  func.func @transform_7(%arg0: i32) -> (i32, i32) {
    %c0_i32 = arith.constant 0 : i32
    %c0_i32_0 = arith.constant 0 : i32
    %c0_i32_1 = arith.constant 0 : i32
    return %c0_i32, %c0_i32_0 : i32, i32
  }
  func.func @transform_8(%arg0: i32) -> (i32, i32) {
    %c0_i32 = arith.constant 0 : i32
    %c0_i32_0 = arith.constant 0 : i32
    %c0_i32_1 = arith.constant 0 : i32
    return %c0_i32, %c0_i32_0 : i32, i32
  }
  func.func @transform_9(%arg0: i32) -> (i32, i32, i32) {
    %c0_i32 = arith.constant 0 : i32
    %c0_i32_0 = arith.constant 0 : i32
    %c0_i32_1 = arith.constant 0 : i32
    return %arg0, %c0_i32, %c0_i32_0 : i32, i32, i32
  }
}

</mosaic_0001>

<bundles_post_ra>
// kernel: tpu_custom_call.1
= control target key start
LH: loop header
LB: loop body
LE: loop exit
PB: predicated region body
PF: predicated region fallthrough
CT: control target
= control target key end

     0   :  { %14 = vsyncpa [#allocation3], 0  ;;  %s7172_s0 = inlined_call_operand.hbm [shape: f32[8,64,128], index: 0, kind: input, shape index: {}]   ;;  %s7173_s1 = inlined_call_operand.vmem [shape: bf16[128,32], index: 1, kind: input, shape index: {}]   ;;  %s7174_s2 = inlined_call_operand.vmem [shape: f32[1,32], index: 2, kind: input, shape index: {}]   ;;  %s7175_s3 = inlined_call_operand.vmem [shape: bf16[9,32,32], index: 3, kind: input, shape index: {}]   ;;  %s7176_s4 = inlined_call_operand.vmem [shape: f32[1,32], index: 4, kind: input, shape index: {}]   ;;  %s7177_s5 = inlined_call_operand.vmem [shape: bf16[32,128], index: 5, kind: input, shape index: {}]   ;;  %s7178_s6 = inlined_call_operand.vmem [shape: f32[1,128], index: 6, kind: input, shape index: {}]   ;;  %s7179_s7 = inlined_call_operand.vmem [shape: f32[128,8], index: 7, kind: input, shape index: {}]   ;;  %s7180_s8 = inlined_call_operand.vmem [shape: f32[8,128], index: 8, kind: input, shape index: {}]   ;;  %s7181_s9 = inlined_call_operand.hbm [shape: f32[8,64,128], index: 9, kind: output, shape index: {}]  }
   0x1   :  { %16 = vsyncpa [#allocation3 + $0x1], 0 }
   0x2   :  { %17 = vsyncpa [#allocation4], 0 }
   0x3   :  { %19 = vsyncpa [#allocation4 + $0x1], 0  ;;  %s5350_s30 = smov 0   ;;  %s5352_s10 = smov 0  }
   0x4   :  { %s5354_s11 = smov 0   ;;  %s5356_s12 = smov 0  }
   0x5 LB: > { %s5371_s13 = sadd.s32 4294967295, %s5288_s12   ;;  %s3875_s14 = sadd.s32 4294967294, %s5288_s12   ;;  %s5288_s12 = sphi %s5356_s12, %s7432_s12   ;;  %s5284_s11 = sphi %s5354_s11, %s7431_s11   ;;  %s5280_s10 = sphi %s5352_s10, %s7430_s10   ;;  %s5276_s30 = sphi %s5350_s30, %s7429_s30  }
   0x6   : > { %s5375_s15 = sadd.s32 1, %s5288_s12   ;;  %s32_s16 = sadd.s32 1, %s5284_s11 }
   0x7   : > { %s29_s17 = ssub.s32 %s5288_s12, %s5375_s15  ;;  %p39_p0 = scmp.ne.s32.totalorder %s5284_s11, %s5280_s10 }
   0x8   : > { %p30_p1 = scmp.eq.s32.totalorder %s29_s17, 0  ;;  %p40_p2 = scmp.eq.s32.totalorder %s5288_s12, 0 }
   0x9   : > { %p45_p3 = scmp.ne.s32.totalorder %s5280_s10, %s5276_s30  ;;  %p46_p4 = scmp.eq.s32.totalorder %s5371_s13, 0 }
   0xa   : > { %s5387_s18 = scalar_select %p30_p1, %s5284_s11, %s32_s16  }
   0xb   : > { %p5389_p5 = por %p40_p2, %p39_p0  ;;  %p5393_p6 = por %p46_p4, %p45_p3 }
   0xc   : > { %p237_p7 = scmp.eq.s32.totalorder %s5371_s13, 1  ;;  %p243_p8 = scmp.eq.s32.totalorder %s3875_s14, 1 }
   0xd   : > { %p5086_p10 = scmp.lt.s32.totalorder %s5288_s12, 2  ;;  %s287_s23 = sand.u32 1, %s5284_s11  }
   0xe   : > { %p5400_p11 = por %p237_p7, %p39_p0  ;;  %p5404_p12 = por %p243_p8, %p45_p3 }
   0xf   : > { %s4116_s24 = sshll.u32 %s5288_s12, 12  ;;  %s3878_s25 = sshll.u32 %s287_s23, 8 }
  0x10   : > { %s7252_s21 = scalar_select %p5400_p11, 1, 0 }
  0x11   : > { %s7253_s22 = scalar_select %p5404_p12, 1, 0 }
  0x12   : > { %s5413_s28 = scalar_lea.hbm %s7172_s0, %s4116_s24  ;;  %s291_s29 = scalar_lea.vmem [#allocation2], %s3878_s25 }
  0x13   : > { %s299_s14 = sshll.u32 %s291_s29, 4  ;;  %p5417_p13 = pnand %p5086_p10, %p5389_p5  ;;  %s5421_s14 = int_to_ptr.vmem [resolvable:$true] %s299_s14 }
  0x14   : > { %s5423_s17 = scalar_lea.sflag [#allocation3], %s287_s23  ;;  %s5192_s26 = scalar_lea.hbm %s5413_s28, 4096 }
  0x15   : > { %p5193_p0 = scmp.ne.s32.totalorder %s5413_s28, %s5192_s26  ;;  %p5194_p1 = pneg %p5417_p13 }
  0x16   : > { %s5197_s25 = scalar_lea.hbm %s7172_s0, 8192  ;;  %p5198_p4 = scmp.lt.u32.totalorder %s5413_s28, %s7172_s0 }
  0x17   : > { %p5195_p2 = pnand %p5194_p1, %p5193_p0  ;;  %p5199_p5 = scmp.lt.u32.totalorder %s5197_s25, %s5192_s26 }
  0x18   : > { %p5201_p8 = scmp.lt.u32.totalorder %s5192_s26, %s5413_s28 }
  0x19   : > { %p5196_p3 = pneg %p5195_p2  ;;  %p5200_p7 = por %p5199_p5, %p5198_p4 }
  0x1b   : > { %p5202_p10 = por %p5201_p8, %p5200_p7 }
  0x1d   : > { %p5203_p9 = pnand %p5202_p10, %p5196_p3 }
  0x1f   : > { %5206 = shalt.err (!%p5203_p9)
}
  0x20   : > { %s5207_s23 = scalar_lea.vmem %s5421_s14, 4096  ;;  %s5290_s24 = smov [#allocation2]  }
  0x21   : > { %p5208_p0 = scmp.ne.s32.totalorder %s5421_s14, %s5207_s23  ;;  %s5212_s19 = sshll.u32 %s5290_s24, 4  ;;  %s5213_s19 = int_to_ptr.vmem [resolvable:$false] %s5212_s19 }
  0x22   : > { %s5214_s27 = scalar_lea.vmem %s5213_s19, 8192  ;;  %p5215_p11 = scmp.lt.s32.totalorder %s5421_s14, %s5213_s19 }
  0x23   : > { %p5210_p2 = pnand %p5208_p0, %p5194_p1  ;;  %p5216_p4 = scmp.lt.s32.totalorder %s5214_s27, %s5207_s23 }
  0x25   : > { %p5211_p12 = pneg %p5210_p2  ;;  %p5217_p5 = por %p5216_p4, %p5215_p11 }
  0x27   : > { %p5218_p7 = pnand %p5217_p5, %p5211_p12 }
  0x29   : > { %5221 = shalt.err (!%p5218_p7)
}
  0x2a   : > { %s5291_s26 = smov 128   ;;  %s5292_s25 = smov 8  }
  0x2b   : > { %5081 = dma.hbm_to_vmem [thread:$0]  (!%p5417_p13), %s5413_s28, 4096, %s5421_s14, %s5423_s17, %s5291_s26, %s5291_s26, %s5292_s25  }
  0x2c   : > { %p3882_p9 = scmp.ge.s32.totalorder %s5288_s12, 1  ;;  %p307_p1 = scmp.lt.s32.totalorder %s5288_s12, 3 }
  0x2e   : > { %p308_p3 = pnand %p3882_p9, %p307_p1 }
  0x30   : > { %311 = sbr.rel (%p308_p3) target bundleno = 1664 (0x680), region = 56 }
  0x37   : > { %s5454_s29 = sand.u32 1, %s5280_s10  }
  0x38   : > { %s3883_s23 = sshll.u32 %s5454_s29, 8  ;;  %s314_s24 = scalar_lea.sflag [#allocation3], %s5454_s29 }
  0x39   : > { %s5460_s19 = scalar_lea.vmem [#allocation2], %s3883_s23 }
  0x3a   : > { %5267 = dma.done.wait (%p5393_p6), %s314_s24, 4096  }
  0x3b   : > { %5269 = vsyncadd (%p5393_p6), %s314_s24, 4294963200  ;;  %v5128_v0 = vld [vmem:[%s7173_s1] sm:$0xff]   ;;  %v5129_v1 = vld [vmem:[%s7173_s1 + $0x8] sm:$0xff]   ;;  %v667_v63 = vlaneseq  ;;  %vm854_vm0 = vcmask 261120   ;;  %vm5295_vm3 = vmmov 0   ;;  %vm3455_vm4 = vcmask 1041409  }
  0x3c   : > { %4342 = vmatprep.subr.bf16.mxu0 %v5128_v0  ;;  %v5130_v2 = vld [vmem:[%s7173_s1 + $0x10] sm:$0xff]   ;;  %v5131_v3 = vld [vmem:[%s7173_s1 + $0x18] sm:$0xff]   ;;  %v355_v4 = vld [vmem:[%s5460_s19] sm:$0xff]  ;;  %vm3457_vm5 = vcmask 1042434   ;;  %vm3459_vm6 = vcmask 1043459   ;;  %vm3534_vm7 = vcmask 64512  }
  0x3d   : > { %4343 = vmatpush3.bf16.msra.mxu0 %v5128_v0  ;;  %v356_v5 = vld [vmem:[%s5460_s19 + $0x8] sm:$0xff]  ;;  %v5132_v7 = vld [vmem:[%s7173_s1 + $0x20] sm:$0xff]   ;;  %v5134_v9 = vld [vmem:[%s7173_s1 + $0x30] sm:$0xff]   ;;  %s3788_s28 = scalar_lea.sflag [#allocation4], %s5454_s29  ;;  %p7426_p11 = scmp.ne.s32.totalorder %s7252_s21, 0 }
  0x3e   : > { %4344 = vmatprep.subr.bf16.mxu0 %v5129_v1  ;;  %v387_v6 = vpack.c.bf16 %v356_v5, %v355_v4  ;;  %v5133_v8 = vld [vmem:[%s7173_s1 + $0x28] sm:$0xff]   ;;  %v5135_v10 = vld [vmem:[%s7173_s1 + $0x38] sm:$0xff]   ;;  %v357_v11 = vld [vmem:[%s5460_s19 + $0x10] sm:$0xff]  ;;  %s5297_s16 = smov [#allocation5]  }
  0x3f   : > { %v358_v12 = vld [vmem:[%s5460_s19 + $0x18] sm:$0xff]  ;;  %v359_v13 = vld [vmem:[%s5460_s19 + $0x20] sm:$0xff]  ;;  %v360_v14 = vld [vmem:[%s5460_s19 + $0x28] sm:$0xff]  ;;  %s5226_s17 = sshll.u32 %s5297_s16, 4  ;;  %s5227_s17 = int_to_ptr.vmem [resolvable:$false] %s5226_s17 }
  0x40   : > { %4358 = vmatprep.mubr.bf16.mxu0 %v387_v6  ;;  %v388_v15 = vpack.c.bf16 %v358_v12, %v357_v11  ;;  %v389_v16 = vpack.c.bf16 %v360_v14, %v359_v13  ;;  %v361_v17 = vld [vmem:[%s5460_s19 + $0x30] sm:$0xff]  ;;  %v362_v18 = vld [vmem:[%s5460_s19 + $0x38] sm:$0xff]  ;;  %v363_v19 = vld [vmem:[%s5460_s19 + $0x40] sm:$0xff]  ;;  %v7183_v14 = vmov 0.0   ;;  %s5228_s27 = scalar_lea.vmem %s5227_s17, 8192 }
  0x41   : > { %4345 = vmatpush3.bf16.msra.mxu0 %v5129_v1  ;;  %v364_v20 = vld [vmem:[%s5460_s19 + $0x48] sm:$0xff]  ;;  %v390_v21 = vpack.c.bf16 %v362_v18, %v361_v17  ;;  %v365_v23 = vld [vmem:[%s5460_s19 + $0x50] sm:$0xff]  ;;  %v366_v24 = vld [vmem:[%s5460_s19 + $0x58] sm:$0xff] }
  0x42   : > { %4346 = vmatprep.subr.bf16.mxu0 %v5130_v2  ;;  %v391_v22 = vpack.c.bf16 %v364_v20, %v363_v19  ;;  %v367_v25 = vld [vmem:[%s5460_s19 + $0x60] sm:$0xff]  ;;  %v368_v26 = vld [vmem:[%s5460_s19 + $0x68] sm:$0xff]  ;;  %v392_v27 = vpack.c.bf16 %v366_v24, %v365_v23  ;;  %v369_v29 = vld [vmem:[%s5460_s19 + $0x70] sm:$0xff] }
  0x43   : > { %v393_v28 = vpack.c.bf16 %v368_v26, %v367_v25  ;;  %v370_v30 = vld [vmem:[%s5460_s19 + $0x78] sm:$0xff]  ;;  %v371_v31 = vld [vmem:[%s5460_s19 + $0x80] sm:$0xff]  ;;  %v372_v32 = vld [vmem:[%s5460_s19 + $0x88] sm:$0xff] }
  0x44   : > { %v394_v33 = vpack.c.bf16 %v370_v30, %v369_v29  ;;  %v395_v34 = vpack.c.bf16 %v372_v32, %v371_v31  ;;  %v373_v35 = vld [vmem:[%s5460_s19 + $0x90] sm:$0xff]  ;;  %v374_v36 = vld [vmem:[%s5460_s19 + $0x98] sm:$0xff]  ;;  %v375_v37 = vld [vmem:[%s5460_s19 + $0xa0] sm:$0xff] }
  0x45   : > { %4347 = vmatpush3.bf16.msra.mxu0 %v5130_v2  ;;  %v376_v38 = vld [vmem:[%s5460_s19 + $0xa8] sm:$0xff]  ;;  %v396_v39 = vpack.c.bf16 %v374_v36, %v373_v35  ;;  %v377_v41 = vld [vmem:[%s5460_s19 + $0xb0] sm:$0xff]  ;;  %v378_v42 = vld [vmem:[%s5460_s19 + $0xb8] sm:$0xff] }
  0x46   : > { %4348 = vmatprep.subr.bf16.mxu0 %v5131_v3  ;;  %v397_v40 = vpack.c.bf16 %v376_v38, %v375_v37  ;;  %v379_v43 = vld [vmem:[%s5460_s19 + $0xc0] sm:$0xff]  ;;  %v380_v44 = vld [vmem:[%s5460_s19 + $0xc8] sm:$0xff]  ;;  %v398_v45 = vpack.c.bf16 %v378_v42, %v377_v41  ;;  %v381_v47 = vld [vmem:[%s5460_s19 + $0xd0] sm:$0xff] }
  0x47   : > { %v399_v46 = vpack.c.bf16 %v380_v44, %v379_v43  ;;  %v382_v48 = vld [vmem:[%s5460_s19 + $0xd8] sm:$0xff]  ;;  %v383_v49 = vld [vmem:[%s5460_s19 + $0xe0] sm:$0xff]  ;;  %v384_v50 = vld [vmem:[%s5460_s19 + $0xe8] sm:$0xff] }
  0x48   : > { %v400_v51 = vpack.c.bf16 %v382_v48, %v381_v47  ;;  %v401_v52 = vpack.c.bf16 %v384_v50, %v383_v49  ;;  %v385_v53 = vld [vmem:[%s5460_s19 + $0xf0] sm:$0xff]  ;;  %v386_v54 = vld [vmem:[%s5460_s19 + $0xf8] sm:$0xff]  ;;  %v5545_v60 = vld [vmem:[%s7175_s3 + $0x40] sm:$0xff]  }
  0x49   : > { %4349 = vmatpush3.bf16.msra.mxu0 %v5131_v3  ;;  %v402_v55 = vpack.c.bf16 %v386_v54, %v385_v53  ;;  %v5136_v56 = vld [vmem:[%s7175_s3 + $0x10] sm:$0xff]   ;;  %v5137_v57 = vld [vmem:[%s7175_s3 + $0x18] sm:$0xff]   ;;  %v5142_v61 = vld [vmem:[%s7175_s3] sm:$0xff]   ;;  %v5557_v3 = vshrl.u32 %v667_v63, 7 }
  0x4a   : > { %4350 = vmatprep.subr.bf16.mxu0 %v5132_v7  ;;  %v5531_v58 = vld [vmem:[%s7175_s3 + $0x30] sm:$0xff]   ;;  %v5538_v59 = vld [vmem:[%s7175_s3 + $0x38] sm:$0xff]   ;;  %v5554_v62 = vld [vmem:[%s7174_s2] ss:$0 sm:$0xff] }
  0x4b   : > { %4814 = vmatprep.subr.bf16.mxu1 %v5531_v58  ;;  %7255 = vst [vmem:[#allocation8_spill] sm:$0xff] %v5538_v59  ;;  %vm669_vm1 = vcmp.ge.s32.totalorder %v5557_v3, 1  ;;  %vm735_vm2 = vcmp.le.s32.totalorder %v5557_v3, 6  ;;  %v5143_v23 = vld [vmem:[%s7175_s3 + $0x8] sm:$0xff]   ;;  %v5624_v41 = vld [vmem:[%s7175_s3 + $0x20] sm:$0xff]  }
  0x4c   : > { %4816 = vmatpush3.bf16.msra.mxu1 %v5531_v58 }
  0x4d   : > { %4351 = vmatpush3.bf16.msra.mxu0 %v5132_v7  ;;  %4815 = vmatprep.subr.bf16.mxu1 %v5538_v59 }
  0x4e   : > { %4352 = vmatprep.subr.bf16.mxu0 %v5133_v8 }
  0x50   : > { %4817 = vmatpush3.bf16.msra.mxu1 %v5538_v59 }
  0x51   : > { %4353 = vmatpush3.bf16.msra.mxu0 %v5133_v8  ;;  %4534 = vmatprep.subr.bf16.mxu1 %v5545_v60 }
  0x52   : > { %4354 = vmatprep.subr.bf16.mxu0 %v5134_v9 }
  0x55   : > { %4355 = vmatpush3.bf16.msra.mxu0 %v5134_v9 }
  0x56   : > { %4356 = vmatprep.subr.bf16.mxu0 %v5135_v10 }
  0x59   : > { %4357 = vmatpush3.bf16.msra.mxu0 %v5135_v10 }
  0x5a   : > { %4390 = vmatprep.subr.bf16.mxu0 %v5136_v56 }
  0x5c   : > { %4359 = vmatmul.mubr.bf16.vlgmr.msra.gmra.mrb[0].mxu0 %v388_v15 }
  0x5d   : > { %4362 = vmatprep.mubr.bf16.mxu0 %v389_v16  ;;  %4391 = vmatpush3.bf16.msra.mxu0 %v5136_v56 }
  0x5e   : > { %4392 = vmatprep.subr.bf16.mxu0 %v5137_v57 }
  0x61   : > { %4393 = vmatpush3.bf16.msra.mxu0 %v5137_v57 }
  0x62   : > { %4426 = vmatprep.subr.bf16.mxu0 %v5142_v61 }
  0x64   : > { %4363 = vmatmul.mubr.bf16.gmra.mrb[4].mxu0 %v390_v21 }
  0x65   : > { %4366 = vmatprep.mubr.bf16.mxu0 %v391_v22 }
  0x6c   : > { %4367 = vmatmul.mubr.bf16.gmra.mrb[8].mxu0 %v392_v27 }
  0x6d   : > { %4370 = vmatprep.mubr.bf16.mxu0 %v393_v28 }
  0x74   : > { %4371 = vmatmul.mubr.bf16.gmra.mrb[12].mxu0 %v394_v33 }
  0x75   : > { %4374 = vmatprep.mubr.bf16.mxu0 %v395_v34 }
  0x7c   : > { %4375 = vmatmul.mubr.bf16.gmra.mrb[16].mxu0 %v396_v39 }
  0x7d   : > { %4378 = vmatprep.mubr.bf16.mxu0 %v397_v40 }
  0x84   : > { %4379 = vmatmul.mubr.bf16.gmra.mrb[20].mxu0 %v398_v45 }
  0x85   : > { %4382 = vmatprep.mubr.bf16.mxu0 %v399_v46 }
  0x8c   : > { %4383 = vmatmul.mubr.bf16.gmra.mrb[24].mxu0 %v400_v51 }
  0x8d   : > { %4386 = vmatprep.mubr.bf16.mxu0 %v401_v52 }
  0x94   : > { %4387 = vmatmul.mubr.bf16.gmra.mrb[28].mxu0 %v402_v55 }
 0x12f   : > { %v4360_v0 = vpop.f32.mrb[0].mxu0 }
 0x130   : > { %v517_v1 = vadd.f32 %v4360_v0, %v5554_v62  ;;  %v508_v2 = vpop.f32.mrb[1].mxu0 }
 0x131   : > { %v509_v4 = vadd.f32 %v5554_v62, %v508_v2  ;;  %v4361_v5 = vpop.f32.mrb[2].mxu0 }
 0x132   : > { %v5560_v6 = vmax.f32 %v517_v1, 0.0  ;;  %v520_v7 = vadd.f32 %v4361_v5, %v5554_v62  ;;  %v511_v8 = vpop.f32.mrb[3].mxu0 }
 0x133   : > { %v5563_v9 = vmax.f32 %v509_v4, 0.0  ;;  %v512_v10 = vadd.f32 %v5554_v62, %v511_v8 }
 0x134   : > { %v672_v11 = vrot.slane %v5560_v6, 7  ;;  %v5567_v12 = vmax.f32 %v520_v7, 0.0  ;;  %v738_v18 = vrot.slane %v5560_v6, 1 }
 0x135   : > { %v5570_v13 = vmax.f32 %v512_v10, 0.0  ;;  %v821_v15 = vpack.c.bf16 %v5563_v9, %v7183_v14  ;;  %v670_v29 = vrot.slane %v5563_v9, 7  ;;  %v736_v34 = vrot.slane %v5563_v9, 1 }
 0x136   : > { %v673_v16 = vrot.slane %v5567_v12, 7  ;;  %v5591_v24 = vsel %vm669_vm1, %v672_v11, 0.0  ;;  %v5632_v43 = vsel %vm735_vm2, %v738_v18, 0.0  ;;  %v739_v44 = vrot.slane %v5567_v12, 1 }
 0x137   : > { %v671_v19 = vrot.slane %v5570_v13, 7  ;;  %v737_v20 = vrot.slane %v5570_v13, 1  ;;  %v5583_v21 = vpack.c.bf16 %v5560_v6, %v5570_v13  ;;  %v4364_v22 = vpop.f32.mrb[4].mxu0  ;;  %4394 = vmatprep.mubr.msk.bf16.mxu0 %vm854_vm0, %v821_v15  ;;  %7257 = vst [vmem:[#allocation10_spill] sm:$0xff] %v5591_v24  ;;  %7261 = vst [vmem:[#allocation14_spill] sm:$0xff] %v5632_v43  ;;  %v5652_v52 = vsel %vm669_vm1, %v670_v29, 0.0 }
 0x138   : > { %v533_v25 = vadd.f32 %v4364_v22, %v5554_v62  ;;  %v524_v26 = vpop.f32.mrb[5].mxu0  ;;  %v5598_v28 = vsel %vm669_vm1, %v673_v16, 0.0  ;;  %7264 = vst [vmem:[#allocation17_spill] sm:$0xff] %v5652_v52  ;;  %v5662_v55 = vsel %vm735_vm2, %v736_v34, 0.0  ;;  %v5695_v15 = vsel %vm735_vm2, %v739_v44, 0.0 }
 0x139   : > { %7256 = vst [vmem:[#allocation9_spill] sm:$0xff] %v5583_v21  ;;  %7258 = vst [vmem:[#allocation11_spill] sm:$0xff] %v5598_v28  ;;  %v5603_v30 = vsel %vm669_vm1, %v671_v19, 0.0  ;;  %v525_v31 = vadd.f32 %v5554_v62, %v524_v26  ;;  %v4365_v32 = vpop.f32.mrb[6].mxu0  ;;  %4395 = vmatmul.mubr.msk.bf16.vlgmr.msra.gmra.mrb[32].mxu0 %vm854_vm0, %v5583_v21  ;;  %v5628_v42 = vsel %vm735_vm2, %v737_v20, 0.0 }
 0x13a   : > { %7259 = vst [vmem:[#allocation12_spill] sm:$0xff] %v5603_v30  ;;  %v5613_v35 = vpack.c.bf16 %v5591_v24, %v5603_v30  ;;  %v5615_v36 = vmax.f32 %v533_v25, 0.0  ;;  %v536_v37 = vadd.f32 %v4365_v32, %v5554_v62  ;;  %v527_v38 = vpop.f32.mrb[7].mxu0  ;;  %4427 = vmatpush3.bf16.msra.mxu0 %v5142_v61  ;;  %7260 = vst [vmem:[#allocation13_spill] sm:$0xff] %v5628_v42 }
 0x13b   : > { %v5618_v39 = vmax.f32 %v525_v31, 0.0  ;;  %v528_v40 = vadd.f32 %v5554_v62, %v527_v38  ;;  %4428 = vmatprep.subr.bf16.mxu0 %v5143_v23  ;;  %v5640_v47 = vpack.c.bf16 %v5632_v43, %v5628_v42  ;;  %7265 = vst [vmem:[#allocation18_spill] sm:$0xff] %v5662_v55  ;;  %7268 = vst [vmem:[#allocation21_spill] sm:$0xff] %v5695_v15 }
 0x13c   : > { %v676_v45 = vrot.slane %v5615_v36, 7  ;;  %v5636_v46 = vmax.f32 %v536_v37, 0.0  ;;  %v742_v38 = vrot.slane %v5615_v36, 1 }
 0x13d   : > { %7262 = vst [vmem:[#allocation15_spill] sm:$0xff] %v5640_v47  ;;  %v674_v48 = vrot.slane %v5618_v39, 7  ;;  %v740_v49 = vrot.slane %v5618_v39, 1  ;;  %v5644_v50 = vmax.f32 %v528_v40, 0.0  ;;  %v5648_v51 = vpack.c.bf16 %v5618_v39, %v5567_v12 }
 0x13e   : > { %4429 = vmatpush3.bf16.msra.mxu0 %v5143_v23  ;;  %v5656_v53 = vsel %vm669_vm1, %v676_v45, 0.0 }
 0x13f   : > { %7263 = vst [vmem:[#allocation16_spill] sm:$0xff] %v5648_v51  ;;  %v675_v56 = vrot.slane %v5644_v50, 7  ;;  %v741_v57 = vrot.slane %v5644_v50, 1  ;;  %v4368_v61 = vpop.f32.mrb[8].mxu0  ;;  %4398 = vmatprep.mubr.msk.bf16.mxu0 %vm854_vm0, %v5648_v51  ;;  %v5670_v63 = vpack.c.bf16 %v5615_v36, %v5644_v50  ;;  %v5674_v0 = vsel %vm669_vm1, %v674_v48, 0.0  ;;  %4462 = vmatprep.subr.bf16.mxu0 %v5624_v41 }
 0x140   : > { %v549_v1 = vadd.f32 %v4368_v61, %v5554_v62  ;;  %v540_v2 = vpop.f32.mrb[9].mxu0  ;;  %v5680_v4 = vpack.c.bf16 %v5674_v0, %v5598_v28  ;;  %v5699_v16 = vsel %vm735_vm2, %v740_v49, 0.0  ;;  %v5735_v49 = vpack.c.bf16 %v5652_v52, %v7183_v14 }
 0x141   : > { %7266 = vst [vmem:[#allocation19_spill] sm:$0xff] %v5670_v63  ;;  %v541_v8 = vadd.f32 %v5554_v62, %v540_v2  ;;  %v4369_v10 = vpop.f32.mrb[10].mxu0  ;;  %4399 = vmatmul.mubr.msk.bf16.gmra.mrb[36].mxu0 %vm854_vm0, %v5670_v63  ;;  %v5691_v11 = vsel %vm669_vm1, %v675_v56, 0.0  ;;  %7269 = vst [vmem:[#allocation22_spill] sm:$0xff] %v5699_v16  ;;  %v5710_v23 = vpack.c.bf16 %v5699_v16, %v5695_v15  ;;  %v5719_v31 = vsel %vm735_vm2, %v741_v57, 0.0 }
 0x142   : > { %7267 = vst [vmem:[#allocation20_spill] sm:$0xff] %v5680_v4  ;;  %v5701_v18 = vmax.f32 %v549_v1, 0.0  ;;  %v552_v19 = vadd.f32 %v4369_v10, %v5554_v62  ;;  %v543_v20 = vpop.f32.mrb[11].mxu0  ;;  %v5706_v22 = vpack.c.bf16 %v5656_v53, %v5691_v11  ;;  %7271 = vst [vmem:[#allocation24_spill] sm:$0xff] %v5719_v31 }
 0x143   : > { %7270 = vst [vmem:[#allocation23_spill] sm:$0xff] %v5710_v23  ;;  %v5712_v25 = vmax.f32 %v541_v8, 0.0  ;;  %v544_v26 = vadd.f32 %v5554_v62, %v543_v20 }
 0x144   : > { %v5721_v32 = vmax.f32 %v552_v19, 0.0  ;;  %v680_v34 = vrot.slane %v5701_v18, 7 }
 0x145   : > { %v5727_v40 = vmax.f32 %v544_v26, 0.0  ;;  %v825_v44 = vpack.c.bf16 %v5712_v25, %v7183_v14  ;;  %v678_v45 = vrot.slane %v5712_v25, 7  ;;  %v744_v57 = vrot.slane %v5712_v25, 1 }
 0x146   : > { %v681_v48 = vrot.slane %v5721_v32, 7  ;;  %v713_v8 = vsel %vm669_vm1, %v680_v34, 0.0 }
 0x147   : > { %v4372_v61 = vpop.f32.mrb[12].mxu0  ;;  %4402 = vmatprep.mubr.msk.bf16.mxu0 %vm854_vm0, %v825_v44  ;;  %v5743_v1 = vpack.c.bf16 %v5701_v18, %v5727_v40  ;;  %v679_v2 = vrot.slane %v5727_v40, 7  ;;  %v5751_v20 = vsel %vm669_vm1, %v678_v45, 0.0  ;;  %v5764_v45 = vsel %vm735_vm2, %v742_v38, 0.0  ;;  %v5141_v38 = vld [vmem:[%s7175_s3 + $0x48] sm:$0xff]  }
 0x148   : > { %v565_v10 = vadd.f32 %v4372_v61, %v5554_v62  ;;  %v556_v19 = vpop.f32.mrb[13].mxu0  ;;  %v714_v26 = vsel %vm669_vm1, %v681_v48, 0.0  ;;  %7273 = vst [vmem:[#allocation26_spill] sm:$0xff] %v5764_v45  ;;  %v743_v44 = vrot.slane %v5636_v46, 1 }
 0x149   : > { %7272 = vst [vmem:[#allocation25_spill] sm:$0xff] %v5743_v1  ;;  %v557_v33 = vadd.f32 %v5554_v62, %v556_v19  ;;  %v4373_v37 = vpop.f32.mrb[14].mxu0  ;;  %4403 = vmatmul.mubr.msk.bf16.gmra.mrb[40].mxu0 %vm854_vm0, %v5743_v1  ;;  %v712_v34 = vsel %vm669_vm1, %v679_v2, 0.0  ;;  %v1564_v61 = vpack.c.bf16 %v714_v26, %v713_v8 }
 0x14a   : > { %v5766_v29 = vmax.f32 %v565_v10, 0.0  ;;  %v568_v48 = vadd.f32 %v4373_v37, %v5554_v62  ;;  %v559_v7 = vpop.f32.mrb[15].mxu0  ;;  %v5769_v56 = vpack.c.bf16 %v713_v8, %v712_v34  ;;  %v1563_v19 = vpack.c.bf16 %v712_v34, %v5751_v20 }
 0x14b   : > { %v5773_v54 = vmax.f32 %v557_v33, 0.0  ;;  %v560_v2 = vadd.f32 %v5554_v62, %v559_v7  ;;  %v5781_v10 = vpack.c.bf16 %v5764_v45, %v5719_v31  ;;  %v745_v33 = vrot.slane %v5727_v40, 1 }
 0x14c   : > { %7274 = vst [vmem:[#allocation27_spill] sm:$0xff] %v5766_v29  ;;  %v684_v34 = vrot.slane %v5766_v29, 7  ;;  %v5786_v5 = vmax.f32 %v568_v48, 0.0  ;;  %4510 = vmatprep.mubr.msk.bf16.mxu1 %vm854_vm0, %v1563_v19  ;;  %v5805_v19 = vsel %vm735_vm2, %v744_v57, 0.0  ;;  %v5821_v57 = vld [vmem:[%s7175_s3 + $0x50] sm:$0xff]  }
 0x14d   : > { %7275 = vst [vmem:[#allocation28_spill] sm:$0xff] %v5781_v10  ;;  %v682_v7 = vrot.slane %v5773_v54, 7  ;;  %v5791_v17 = vmax.f32 %v560_v2, 0.0  ;;  %4511 = vmatmul.mubr.msk.bf16.vlgmr.msra.gmra.mrb[0].mxu1 %vm854_vm0, %v1564_v61  ;;  %v5796_v27 = vpack.c.bf16 %v5773_v54, %v5721_v32  ;;  %7277 = vst [vmem:[#allocation30_spill] sm:$0xff] %v5805_v19  ;;  %v7285_v10 = vrot.slane %v5701_v18, 1 }
 0x14e   : > { %v685_v37 = vrot.slane %v5786_v5, 7  ;;  %4535 = vmatpush3.bf16.msra.mxu1 %v5545_v60  ;;  %v717_v48 = vsel %vm669_vm1, %v684_v34, 0.0 }
 0x14f   : > { %7276 = vst [vmem:[#allocation29_spill] sm:$0xff] %v5796_v27  ;;  %v683_v2 = vrot.slane %v5791_v17, 7  ;;  %v4376_v61 = vpop.f32.mrb[16].mxu0  ;;  %4406 = vmatprep.mubr.msk.bf16.mxu0 %vm854_vm0, %v5796_v27  ;;  %v5812_v8 = vpack.c.bf16 %v5766_v29, %v5791_v17  ;;  %v715_v60 = vsel %vm669_vm1, %v682_v7, 0.0  ;;  %4536 = vmatprep.subr.bf16.mxu1 %v5141_v38 }
 0x150   : > { %v581_v14 = vadd.f32 %v4376_v61, %v5554_v62  ;;  %v572_v1 = vpop.f32.mrb[17].mxu0  ;;  %v5826_v27 = vsel %vm669_vm1, %v685_v37, 0.0  ;;  %v5828_v63 = vpack.c.bf16 %v715_v60, %v714_v26  ;;  %v5840_v37 = vsel %vm735_vm2, %v743_v44, 0.0 }
 0x151   : > { %7278 = vst [vmem:[#allocation31_spill] sm:$0xff] %v5812_v8  ;;  %7279 = vst [vmem:[#allocation32_spill] sm:$0xff] %v5826_v27  ;;  %v573_v34 = vadd.f32 %v5554_v62, %v572_v1  ;;  %v4377_v51 = vpop.f32.mrb[18].mxu0  ;;  %4407 = vmatmul.mubr.msk.bf16.gmra.mrb[44].mxu0 %vm854_vm0, %v5812_v8  ;;  %v716_v21 = vsel %vm669_vm1, %v683_v2, 0.0  ;;  %v1566_v61 = vpack.c.bf16 %v5826_v27, %v717_v48 }
 0x152   : > { %7280 = vst [vmem:[#allocation33_spill] sm:$0xff] %v5840_v37  ;;  %v5842_v26 = vmax.f32 %v581_v14, 0.0  ;;  %v584_v24 = vadd.f32 %v4377_v51, %v5554_v62  ;;  %v575_v7 = vpop.f32.mrb[19].mxu0  ;;  %v1565_v28 = vpack.c.bf16 %v716_v21, %v715_v60  ;;  %4537 = vmatpush3.bf16.msra.mxu1 %v5141_v38  ;;  %v5845_v1 = vpack.c.bf16 %v717_v48, %v716_v21 }
 0x153   : > { %v5847_v30 = vmax.f32 %v573_v34, 0.0  ;;  %v576_v8 = vadd.f32 %v5554_v62, %v575_v7  ;;  %4570 = vmatprep.subr.bf16.mxu1 %v5821_v57  ;;  %v5855_v14 = vsel %vm735_vm2, %v745_v33, 0.0  ;;  %v748_v51 = vrot.slane %v5773_v54, 1 }
 0x154   : > { %7281 = vst [vmem:[#allocation34_spill] sm:$0xff] %v5845_v1  ;;  %7282 = vst [vmem:[#allocation35_spill] sm:$0xff] %v5855_v14  ;;  %v688_v44 = vrot.slane %v5842_v26, 7  ;;  %v5859_v38 = vmax.f32 %v584_v24, 0.0  ;;  %4514 = vmatprep.mubr.msk.bf16.mxu1 %vm854_vm0, %v1565_v28  ;;  %v7283_v33 = vmov 0.0  }
 0x155   : > { %v686_v60 = vrot.slane %v5847_v30, 7  ;;  %v5866_v7 = vmax.f32 %v576_v8, 0.0  ;;  %4515 = vmatmul.mubr.msk.bf16.gmra.mrb[4].mxu1 %vm854_vm0, %v1566_v61  ;;  %v829_v34 = vpack.c.bf16 %v5847_v30, %v7283_v33 }
 0x156   : > { %v689_v28 = vrot.slane %v5859_v38, 7  ;;  %v721_v2 = vsel %vm669_vm1, %v688_v44, 0.0 }
 0x157   : > { %v687_v27 = vrot.slane %v5866_v7, 7  ;;  %v4380_v8 = vpop.f32.mrb[20].mxu0  ;;  %4410 = vmatprep.mubr.msk.bf16.mxu0 %vm854_vm0, %v829_v34  ;;  %v5881_v61 = vpack.c.bf16 %v5842_v26, %v5866_v7  ;;  %v5888_v21 = vsel %vm669_vm1, %v686_v60, 0.0  ;;  %v5903_v60 = vsel %vm735_vm2, %v7285_v10, 0.0 }
 0x158   : > { %v597_v24 = vadd.f32 %v4380_v8, %v5554_v62  ;;  %v588_v52 = vpop.f32.mrb[21].mxu0  ;;  %v722_v48 = vsel %vm669_vm1, %v689_v28, 0.0  ;;  %7286 = vst [vmem:[#allocation37_spill] sm:$0xff] %v5903_v60  ;;  %v5917_v43 = vpack.c.bf16 %v5903_v60, %v5855_v14 }
 0x159   : > { %7284 = vst [vmem:[#allocation36_spill] sm:$0xff] %v5881_v61  ;;  %v589_v45 = vadd.f32 %v5554_v62, %v588_v52  ;;  %v4381_v37 = vpop.f32.mrb[22].mxu0  ;;  %4411 = vmatmul.mubr.msk.bf16.gmra.mrb[48].mxu0 %vm854_vm0, %v5881_v61  ;;  %v720_v44 = vsel %vm669_vm1, %v687_v27, 0.0  ;;  %v1568_v8 = vpack.c.bf16 %v722_v48, %v721_v2 }
 0x15a   : > { %v5905_v28 = vmax.f32 %v597_v24, 0.0  ;;  %v600_v34 = vadd.f32 %v4381_v37, %v5554_v62  ;;  %v591_v19 = vpop.f32.mrb[23].mxu0  ;;  %v1567_v52 = vpack.c.bf16 %v720_v44, %v5888_v21  ;;  %v5909_v16 = vpack.c.bf16 %v721_v2, %v720_v44  ;;  %7288 = vst [vmem:[#allocation39_spill] sm:$0xff] %v5917_v43 }
 0x15b   : > { %v5912_v31 = vmax.f32 %v589_v45, 0.0  ;;  %v592_v27 = vadd.f32 %v5554_v62, %v591_v19  ;;  %v7289_v2 = vrot.slane %v5721_v32, 1  ;;  %v5945_v19 = vsel %vm735_vm2, %v748_v51, 0.0 }
 0x15c   : > { %7287 = vst [vmem:[#allocation38_spill] sm:$0xff] %v5909_v16  ;;  %v692_v24 = vrot.slane %v5905_v28, 7  ;;  %v5921_v37 = vmax.f32 %v600_v34, 0.0  ;;  %4518 = vmatprep.mubr.msk.bf16.mxu1 %vm854_vm0, %v1567_v52  ;;  %7292 = vst [vmem:[#allocation42_spill] sm:$0xff] %v5945_v19 }
 0x15d   : > { %v5928_v45 = vsel %vm735_vm2, %v7289_v2, 0.0  ;;  %v690_v44 = vrot.slane %v5912_v31, 7  ;;  %v5932_v61 = vmax.f32 %v592_v27, 0.0  ;;  %4519 = vmatmul.mubr.msk.bf16.gmra.mrb[8].mxu1 %vm854_vm0, %v1568_v8  ;;  %v5937_v34 = vpack.c.bf16 %v5912_v31, %v5859_v38 }
 0x15e   : > { %7290 = vst [vmem:[#allocation40_spill] sm:$0xff] %v5928_v45  ;;  %v693_v10 = vrot.slane %v5921_v37, 7  ;;  %v725_v2 = vsel %vm669_vm1, %v692_v24, 0.0 }
 0x15f   : > { %7291 = vst [vmem:[#allocation41_spill] sm:$0xff] %v5937_v34  ;;  %v691_v27 = vrot.slane %v5932_v61, 7  ;;  %v4384_v43 = vpop.f32.mrb[24].mxu0  ;;  %4414 = vmatprep.mubr.msk.bf16.mxu0 %vm854_vm0, %v5937_v34  ;;  %v5952_v8 = vpack.c.bf16 %v5905_v28, %v5932_v61  ;;  %v723_v52 = vsel %vm669_vm1, %v690_v44, 0.0 }
 0x160   : > { %v613_v14 = vadd.f32 %v4384_v43, %v5554_v62  ;;  %v604_v51 = vpop.f32.mrb[25].mxu0  ;;  %v5961_v15 = vsel %vm669_vm1, %v693_v10, 0.0  ;;  %v5963_v59 = vpack.c.bf16 %v723_v52, %v722_v48  ;;  %v5975_v10 = vpack.c.bf16 %v5945_v19, %v5928_v45 }
 0x161   : > { %7293 = vst [vmem:[#allocation43_spill] sm:$0xff] %v5952_v8  ;;  %7294 = vst [vmem:[#allocation44_spill] sm:$0xff] %v5961_v15  ;;  %v605_v23 = vadd.f32 %v5554_v62, %v604_v51  ;;  %v4385_v47 = vpop.f32.mrb[26].mxu0  ;;  %4415 = vmatmul.mubr.msk.bf16.gmra.mrb[52].mxu0 %vm854_vm0, %v5952_v8  ;;  %v724_v24 = vsel %vm669_vm1, %v691_v27, 0.0  ;;  %v1570_v43 = vpack.c.bf16 %v5961_v15, %v725_v2  ;;  %v7298_v15 = vrot.slane %v5791_v17, 1 }
 0x162   : > { %7295 = vst [vmem:[#allocation45_spill] sm:$0xff] %v5963_v59  ;;  %7296 = vst [vmem:[#allocation46_spill] sm:$0xff] %v5975_v10  ;;  %v5977_v48 = vmax.f32 %v613_v14, 0.0  ;;  %v616_v44 = vadd.f32 %v4385_v47, %v5554_v62  ;;  %v607_v34 = vpop.f32.mrb[27].mxu0  ;;  %v1569_v42 = vpack.c.bf16 %v724_v24, %v723_v52  ;;  %v5980_v51 = vpack.c.bf16 %v725_v2, %v724_v24 }
 0x163   : > { %v5982_v55 = vmax.f32 %v605_v23, 0.0  ;;  %v608_v8 = vadd.f32 %v5554_v62, %v607_v34  ;;  %v5991_v10 = vsel %vm735_vm2, %v7298_v15, 0.0 }
 0x164   : > { %7297 = vst [vmem:[#allocation47_spill] sm:$0xff] %v5980_v51  ;;  %7299 = vst [vmem:[#allocation48_spill] sm:$0xff] %v5991_v10  ;;  %v696_v47 = vrot.slane %v5977_v48, 7  ;;  %v5995_v52 = vmax.f32 %v616_v44, 0.0  ;;  %4522 = vmatprep.mubr.msk.bf16.mxu1 %vm854_vm0, %v1569_v42  ;;  %v7303_v51 = vrot.slane %v5766_v29, 1 }
 0x165   : > { %v694_v2 = vrot.slane %v5982_v55, 7  ;;  %v6002_v24 = vmax.f32 %v608_v8, 0.0  ;;  %4523 = vmatmul.mubr.msk.bf16.gmra.mrb[12].mxu1 %vm854_vm0, %v1570_v43  ;;  %v833_v15 = vpack.c.bf16 %v5982_v55, %v7283_v33 }
 0x166   : > { %v697_v42 = vrot.slane %v5995_v52, 7  ;;  %v729_v27 = vsel %vm669_vm1, %v696_v47, 0.0 }
 0x167   : > { %7300 = vst [vmem:[#allocation49_spill] sm:$0xff] %v6002_v24  ;;  %v695_v34 = vrot.slane %v6002_v24, 7  ;;  %v4388_v8 = vpop.f32.mrb[28].mxu0  ;;  %4418 = vmatprep.mubr.msk.bf16.mxu0 %vm854_vm0, %v833_v15  ;;  %v6017_v43 = vpack.c.bf16 %v5977_v48, %v6002_v24  ;;  %v6024_v23 = vsel %vm669_vm1, %v694_v2, 0.0  ;;  %v6039_v2 = vsel %vm735_vm2, %v7303_v51, 0.0 }
 0x168   : > { %v629_v44 = vadd.f32 %v4388_v8, %v5554_v62  ;;  %v620_v19 = vpop.f32.mrb[29].mxu0  ;;  %7302 = vst [vmem:[#allocation51_spill] sm:$0xff] %v6024_v23  ;;  %v730_v14 = vsel %vm669_vm1, %v697_v42, 0.0  ;;  %v6053_v29 = vpack.c.bf16 %v6039_v2, %v5991_v10 }
 0x169   : > { %7301 = vst [vmem:[#allocation50_spill] sm:$0xff] %v6017_v43  ;;  %v621_v60 = vadd.f32 %v5554_v62, %v620_v19  ;;  %v4389_v45 = vpop.f32.mrb[30].mxu0  ;;  %4419 = vmatmul.mubr.msk.bf16.gmra.mrb[56].mxu0 %vm854_vm0, %v6017_v43  ;;  %v728_v47 = vsel %vm669_vm1, %v695_v34, 0.0  ;;  %v1572_v8 = vpack.c.bf16 %v730_v14, %v729_v27  ;;  %v761_v43 = vrot.slane %v6002_v24, 1 }
 0x16a   : > { %v6041_v42 = vmax.f32 %v629_v44, 0.0  ;;  %v632_v15 = vadd.f32 %v4389_v45, %v5554_v62  ;;  %v623_v59 = vpop.f32.mrb[31].mxu0  ;;  %v1571_v19 = vpack.c.bf16 %v728_v47, %v6024_v23  ;;  %v6045_v16 = vpack.c.bf16 %v729_v27, %v728_v47  ;;  %7307 = vst [vmem:[#allocation55_spill] sm:$0xff] %v6053_v29 }
 0x16b   : > { %v6048_v1 = vmax.f32 %v621_v60, 0.0  ;;  %v624_v34 = vadd.f32 %v5554_v62, %v623_v59  ;;  %v7309_v27 = vrot.slane %v5847_v30, 1 }
 0x16c   : > { %7304 = vst [vmem:[#allocation52_spill] sm:$0xff] %v6041_v42  ;;  %7305 = vst [vmem:[#allocation53_spill] sm:$0xff] %v6045_v16  ;;  %v700_v51 = vrot.slane %v6041_v42, 7  ;;  %v766_v44 = vrot.slane %v6041_v42, 1  ;;  %v6057_v45 = vmax.f32 %v632_v15, 0.0  ;;  %4526 = vmatprep.mubr.msk.bf16.mxu1 %vm854_vm0, %v1571_v19 }
 0x16d   : > { %7306 = vst [vmem:[#allocation54_spill] sm:$0xff] %v6048_v1  ;;  %v6064_v60 = vsel %vm735_vm2, %v7309_v27, 0.0  ;;  %v698_v59 = vrot.slane %v6048_v1, 7  ;;  %v764_v62 = vrot.slane %v6048_v1, 1  ;;  %v6068_v47 = vmax.f32 %v624_v34, 0.0  ;;  %4527 = vmatmul.mubr.msk.bf16.gmra.mrb[16].mxu1 %vm854_vm0, %v1572_v8 }
 0x16e   : > { %7308 = vst [vmem:[#allocation56_spill] sm:$0xff] %v6057_v45  ;;  %v6073_v15 = vpack.c.bf16 %v6048_v1, %v5995_v52  ;;  %v701_v19 = vrot.slane %v6057_v45, 7  ;;  %v767_v29 = vrot.slane %v6057_v45, 1  ;;  %v733_v27 = vsel %vm669_vm1, %v700_v51, 0.0 }
 0x16f   : > { %v699_v16 = vrot.slane %v6068_v47, 7  ;;  %v765_v34 = vrot.slane %v6068_v47, 1  ;;  %v6087_v8 = vpack.c.bf16 %v6041_v42, %v6068_v47  ;;  %v731_v24 = vsel %vm669_vm1, %v698_v59, 0.0 }
 0x170   : > { %7310 = vst [vmem:[#allocation57_spill] sm:$0xff] %v6073_v15  ;;  %4422 = vmatprep.mubr.msk.bf16.mxu0 %vm854_vm0, %v6073_v15  ;;  %v6093_v51 = vsel %vm669_vm1, %v701_v19, 0.0  ;;  %v6095_v23 = vpack.c.bf16 %v731_v24, %v730_v14  ;;  %v7313_v45 = vrot.slane %v5786_v5, 1  ;;  %v7314_v42 = vrot.slane %v5866_v7, 1 }
 0x171   : > { %7311 = vst [vmem:[#allocation58_spill] sm:$0xff] %v6087_v8  ;;  %7312 = vst [vmem:[#allocation59_spill] sm:$0xff] %v6093_v51  ;;  %4423 = vmatmul.mubr.msk.bf16.gmra.mrb[60].mxu0 %vm854_vm0, %v6087_v8  ;;  %v732_v59 = vsel %vm669_vm1, %v699_v16, 0.0  ;;  %v1574_v19 = vpack.c.bf16 %v6093_v51, %v733_v27  ;;  %v7316_v8 = vrot.slane %v5842_v26, 1 }
 0x172   : > { %v6103_v15 = vsel %vm735_vm2, %v7313_v45, 0.0  ;;  %v6116_v10 = vsel %vm735_vm2, %v7314_v42, 0.0  ;;  %4430 = vmatprep.mubr.msk.bf16.mxu0 %vm854_vm0, %v5735_v49  ;;  %v1573_v45 = vpack.c.bf16 %v732_v59, %v731_v24  ;;  %v6120_v1 = vpack.c.bf16 %v733_v27, %v732_v59 }
 0x173   : > { %7315 = vst [vmem:[#allocation60_spill] sm:$0xff] %v6116_v10  ;;  %v6128_v14 = vsel %vm735_vm2, %v7316_v8, 0.0  ;;  %v7319_v42 = vrot.slane %v5859_v38, 1  ;;  %v7320_v24 = vrot.slane %v5912_v31, 1  ;;  %v7322_v59 = vrot.slane %v5932_v61, 1 }
 0x174   : > { %7317 = vst [vmem:[#allocation61_spill] sm:$0xff] %v6128_v14  ;;  %v6132_v51 = vpack.c.bf16 %v6128_v14, %v6116_v10  ;;  %4530 = vmatprep.mubr.msk.bf16.mxu1 %vm854_vm0, %v1573_v45 }
 0x175   : > { %v6138_v49 = vsel %vm735_vm2, %v7319_v42, 0.0  ;;  %v6144_v27 = vsel %vm735_vm2, %v7320_v24, 0.0  ;;  %v6150_v8 = vsel %vm735_vm2, %v7322_v59, 0.0  ;;  %v7324_v24 = vrot.slane %v5905_v28, 1  ;;  %4531 = vmatmul.mubr.msk.bf16.gmra.mrb[20].mxu1 %vm854_vm0, %v1574_v19 }
 0x176   : > { %7318 = vst [vmem:[#allocation62_spill] sm:$0xff] %v6132_v51  ;;  %7321 = vst [vmem:[#allocation63_spill] sm:$0xff] %v6144_v27  ;;  %v6155_v16 = vpack.c.bf16 %v6144_v27, %v6138_v49  ;;  %v7326_v59 = vrot.slane %v5982_v55, 1  ;;  %v7327_v51 = vrot.slane %v5921_v37, 1  ;;  %v677_v19 = vrot.slane %v5636_v46, 7 }
 0x177   : > { %7323 = vst [vmem:[#allocation64_spill] sm:$0xff] %v6150_v8  ;;  %v6165_v10 = vsel %vm735_vm2, %v7324_v24, 0.0  ;;  %v6186_v24 = vsel %vm735_vm2, %v761_v43, 0.0  ;;  %v5147_v43 = vld [vmem:[%s7175_s3 + $0x28] sm:$0xff]  }
 0x178   : > { %v6170_v45 = vpack.c.bf16 %v6165_v10, %v6150_v8  ;;  %v6176_v42 = vsel %vm735_vm2, %v7326_v59, 0.0  ;;  %v6182_v27 = vsel %vm735_vm2, %v7327_v51, 0.0  ;;  %7328 = vst [vmem:[#allocation66_spill] sm:$0xff] %v6186_v24  ;;  %v7330_v51 = vrot.slane %v5977_v48, 1 }
 0x179   : > { %v6218_v8 = vsel %vm735_vm2, %v764_v62, 0.0  ;;  %4431 = vmatmul.mubr.msk.bf16.vlgmr.msra.gmra.mrb[32].mxu0 %vm854_vm0, %v5613_v35 }
 0x17a   : > { %7325 = vst [vmem:[#allocation65_spill] sm:$0xff] %v6170_v45  ;;  %v7329_v45 = vpack.c.bf16 %v5570_v13, %v5563_v9  ;;  %v6201_v14 = vsel %vm735_vm2, %v7330_v51, 0.0  ;;  %v7332_v13 = vrot.slane %v5995_v52, 1  ;;  %v6222_v51 = vsel %vm735_vm2, %v765_v34, 0.0  ;;  %4434 = vmatprep.mubr.msk.bf16.mxu0 %vm854_vm0, %v5680_v4  ;;  %4463 = vmatpush3.bf16.msra.mxu0 %v5624_v41 }
 0x17b   : > { %v6208_v9 = vpack.c.bf16 %v6201_v14, %v6186_v24  ;;  %v6244_v34 = vsel %vm735_vm2, %v767_v29, 0.0  ;;  %v6255_v24 = vsel %vm669_vm1, %v677_v19, 0.0  ;;  %v5145_v29 = vld [vmem:[%s7175_s3 + $0x58] sm:$0xff]   ;;  %4464 = vmatprep.subr.bf16.mxu0 %v5147_v43  ;;  %v7333_v4 = vpack.c.bf16 %v5567_v12, %v5560_v6  ;;  %v5148_v19 = vld [vmem:[%s7175_s3 + $0x60] sm:$0xff]  }
 0x17c   : > { %4538 = vmatprep.mubr.msk.bf16.mxu1 %vm854_vm0, %v7329_v45  ;;  %v6214_v45 = vsel %vm735_vm2, %v7332_v13, 0.0  ;;  %v6234_v13 = vsel %vm735_vm2, %v766_v44, 0.0  ;;  %v7334_v41 = vpack.c.bf16 %v5644_v50, %v5618_v39  ;;  %v7335_v6 = vpack.c.bf16 %v5636_v46, %v5615_v36 }
 0x17d   : > { %7331 = vst [vmem:[#allocation67_spill] sm:$0xff] %v6208_v9  ;;  %v6226_v59 = vpack.c.bf16 %v6218_v8, %v6214_v45  ;;  %v6240_v62 = vpack.c.bf16 %v6234_v13, %v6222_v51  ;;  %v2122_v44 = vpack.c.bf16 %v6244_v34, %v6234_v13  ;;  %4539 = vmatmul.mubr.msk.bf16.vlgmr.msra.gmra.mrb[24].mxu1 %vm854_vm0, %v7333_v4  ;;  %v7339_v4 = vld [vmem:[#allocation34_spill] sm:$0xff]  ;;  %v7409_v13 = vld [vmem:[#allocation20_spill] sm:$0xff] }
 0x17e   : > { %4571 = vmatpush3.bf16.msra.mxu1 %v5821_v57  ;;  %4542 = vmatprep.mubr.msk.bf16.mxu1 %vm854_vm0, %v7334_v41  ;;  %v805_v9 = vpack.c.bf16 %v5751_v20, %v7283_v33  ;;  %v7336_v12 = vpack.c.bf16 %v5727_v40, %v5712_v25  ;;  %v7337_v39 = vpack.c.bf16 %v5721_v32, %v5701_v18  ;;  %v7340_v25 = vld [vmem:[#allocation27_spill] sm:$0xff]  ;;  %v7358_v41 = vld [vmem:[#allocation52_spill] sm:$0xff] }
 0x17f   : > { %4572 = vmatprep.subr.bf16.mxu1 %v5145_v29  ;;  %4465 = vmatpush3.bf16.msra.mxu0 %v5147_v43  ;;  %v7338_v36 = vpack.c.bf16 %v5791_v17, %v5773_v54  ;;  %v809_v50 = vpack.c.bf16 %v5888_v21, %v7283_v33  ;;  %v7341_v40 = vpack.c.bf16 %v5786_v5, %v7340_v25  ;;  %v7343_v17 = vld [vmem:[#allocation38_spill] sm:$0xff]  ;;  %v7344_v54 = vld [vmem:[#allocation45_spill] sm:$0xff]  ;;  %v7348_v21 = vld [vmem:[#allocation47_spill] sm:$0xff] }
 0x180   : > { %4498 = vmatprep.subr.bf16.mxu0 %v5531_v58  ;;  %v7342_v18 = vpack.c.bf16 %v5866_v7, %v5847_v30  ;;  %v7345_v32 = vpack.c.bf16 %v5859_v38, %v5842_v26  ;;  %v7346_v20 = vpack.c.bf16 %v5932_v61, %v5912_v31  ;;  %v7347_v30 = vld [vmem:[#allocation51_spill] sm:$0xff]  ;;  %v7349_v7 = vpack.c.bf16 %v5921_v37, %v5905_v28  ;;  %v7350_v26 = vld [vmem:[#allocation49_spill] sm:$0xff]  ;;  %v7354_v28 = vld [vmem:[#allocation54_spill] sm:$0xff] }
 0x181   : > { %4435 = vmatmul.mubr.msk.bf16.gmra.mrb[36].mxu0 %vm854_vm0, %v5706_v22  ;;  %v813_v57 = vpack.c.bf16 %v7347_v30, %v7283_v33  ;;  %v7351_v38 = vpack.c.bf16 %v7350_v26, %v5982_v55  ;;  %v7352_v31 = vld [vmem:[#allocation53_spill] sm:$0xff]  ;;  %v7353_v61 = vpack.c.bf16 %v5995_v52, %v5977_v48  ;;  %v7355_v43 = vpack.c.bf16 %v6068_v47, %v7354_v28  ;;  %v7356_v55 = vld [vmem:[#allocation18_spill] sm:$0xff]  ;;  %v7362_v47 = vld [vmem:[#allocation15_spill] sm:$0xff] }
 0x182   : > { %4438 = vmatprep.mubr.msk.bf16.mxu0 %vm854_vm0, %v805_v9  ;;  %4573 = vmatpush3.bf16.msra.mxu1 %v5145_v29  ;;  %v1285_v9 = vpack.c.bf16 %v7356_v55, %v7283_v33  ;;  %v7357_v29 = vld [vmem:[#allocation56_spill] sm:$0xff]  ;;  %v7360_v48 = vld [vmem:[#allocation13_spill] sm:$0xff]  ;;  %v7366_v25 = vld [vmem:[#allocation14_spill] sm:$0xff] }
 0x183   : > { %4606 = vmatprep.subr.bf16.mxu1 %v5148_v19  ;;  %v7361_v52 = vpack.c.bf16 %v7360_v48, %v7356_v55  ;;  %v7371_v30 = vld [vmem:[#allocation30_spill] sm:$0xff]  ;;  %v7383_v48 = vld [vmem:[#allocation48_spill] sm:$0xff] }
 0x184   : > { %v7374_v26 = vld [vmem:[#allocation26_spill] sm:$0xff] }
 0x185   : > { %4543 = vmatmul.mubr.msk.bf16.gmra.mrb[28].mxu1 %vm854_vm0, %v7335_v6  ;;  %v7359_v6 = vpack.c.bf16 %v7357_v29, %v7358_v41  ;;  %v7379_v55 = vld [vmem:[#allocation46_spill] sm:$0xff]  ;;  %v7381_v41 = vld [vmem:[#allocation37_spill] sm:$0xff] }
 0x186   : > { %4546 = vmatprep.mubr.msk.bf16.mxu1 %vm854_vm0, %v7336_v12  ;;  %v7363_v12 = vld [vmem:[#allocation23_spill] sm:$0xff] }
 0x189   : > { %4439 = vmatmul.mubr.msk.bf16.gmra.mrb[40].mxu0 %vm854_vm0, %v5769_v56 }
 0x18a   : > { %4442 = vmatprep.mubr.msk.bf16.mxu0 %vm854_vm0, %v5828_v63 }
 0x18d   : > { %4547 = vmatmul.mubr.msk.bf16.gmra.mrb[0].mxu1 %vm854_vm0, %v7337_v39  ;;  %v5149_v39 = vld [vmem:[%s7175_s3 + $0x68] sm:$0xff]  }
 0x18e   : > { %4550 = vmatprep.mubr.msk.bf16.mxu1 %vm854_vm0, %v7338_v36  ;;  %v7364_v36 = vld [vmem:[#allocation8_spill] sm:$0xff] }
 0x191   : > { %4443 = vmatmul.mubr.msk.bf16.gmra.mrb[44].mxu0 %vm854_vm0, %v7339_v4 }
 0x192   : > { %4446 = vmatprep.mubr.msk.bf16.mxu0 %vm854_vm0, %v809_v50  ;;  %v7365_v50 = vld [vmem:[#allocation21_spill] sm:$0xff] }
 0x195   : > { %4551 = vmatmul.mubr.msk.bf16.gmra.mrb[4].mxu1 %vm854_vm0, %v7341_v40  ;;  %v7367_v40 = vpack.c.bf16 %v7365_v50, %v7366_v25  ;;  %v7386_v50 = vld [vmem:[#allocation55_spill] sm:$0xff]  ;;  %v7387_v25 = vpack.c.bf16 %v6103_v15, %v6039_v2 }
 0x196   : > { %4554 = vmatprep.mubr.msk.bf16.mxu1 %vm854_vm0, %v7342_v18  ;;  %v7368_v18 = vld [vmem:[#allocation24_spill] sm:$0xff]  ;;  %v7394_v2 = vld [vmem:[#allocation63_spill] sm:$0xff] }
 0x199   : > { %4447 = vmatmul.mubr.msk.bf16.gmra.mrb[48].mxu0 %vm854_vm0, %v7343_v17 }
 0x19a   : > { %4450 = vmatprep.mubr.msk.bf16.mxu0 %vm854_vm0, %v7344_v54 }
 0x19d   : > { %4555 = vmatmul.mubr.msk.bf16.gmra.mrb[8].mxu1 %vm854_vm0, %v7345_v32  ;;  %v7369_v32 = vld [vmem:[#allocation22_spill] sm:$0xff] }
 0x19e   : > { %4558 = vmatprep.mubr.msk.bf16.mxu1 %vm854_vm0, %v7346_v20  ;;  %v7370_v20 = vpack.c.bf16 %v7368_v18, %v7369_v32  ;;  %v7390_v32 = vld [vmem:[#allocation62_spill] sm:$0xff] }
 0x1a1   : > { %4451 = vmatmul.mubr.msk.bf16.gmra.mrb[52].mxu0 %vm854_vm0, %v7348_v21 }
 0x1a2   : > { %4454 = vmatprep.mubr.msk.bf16.mxu0 %vm854_vm0, %v813_v57  ;;  %v1289_v57 = vpack.c.bf16 %v7371_v30, %v7283_v33 }
 0x1a5   : > { %4559 = vmatmul.mubr.msk.bf16.gmra.mrb[12].mxu1 %vm854_vm0, %v7349_v7  ;;  %v7372_v7 = vld [vmem:[#allocation28_spill] sm:$0xff] }
 0x1a6   : > { %4562 = vmatprep.mubr.msk.bf16.mxu1 %vm854_vm0, %v7351_v38 }
 0x1a9   : > { %4455 = vmatmul.mubr.msk.bf16.gmra.mrb[56].mxu0 %vm854_vm0, %v7352_v31 }
 0x1aa   : > { %4458 = vmatprep.mubr.msk.bf16.mxu0 %vm854_vm0, %v6095_v23 }
 0x1ad   : > { %4563 = vmatmul.mubr.msk.bf16.gmra.mrb[16].mxu1 %vm854_vm0, %v7353_v61  ;;  %v7376_v61 = vld [vmem:[#allocation35_spill] sm:$0xff] }
 0x1ae   : > { %4566 = vmatprep.mubr.msk.bf16.mxu1 %vm854_vm0, %v7355_v43  ;;  %v7377_v28 = vpack.c.bf16 %v7376_v61, %v7371_v30  ;;  %v7378_v43 = vld [vmem:[#allocation39_spill] sm:$0xff]  ;;  %v7397_v61 = vpack.c.bf16 %v6182_v27, %v6165_v10  ;;  %v7402_v10 = vpack.c.bf16 %v6222_v51, %v6218_v8  ;;  %v7406_v8 = vld [vmem:[#allocation10_spill] sm:$0xff]  ;;  %v7408_v51 = vpack.c.bf16 %v5691_v11, %v5674_v0 }
 0x1af   : > { %v7410_v0 = vpack.c.bf16 %v6255_v24, %v5656_v53  ;;  %v2381_v11 = vpack.c.bf16 %v7283_v33, %v6255_v24  ;;  %v7413_v24 = vld [vmem:[#allocation59_spill] sm:$0xff] }
 0x1b1   : > { %4459 = vmatmul.mubr.msk.bf16.gmra.mrb[60].mxu0 %vm854_vm0, %v6120_v1 }
 0x1b2   : > { %4466 = vmatprep.mubr.msk.bf16.mxu0 %vm854_vm0, %v1285_v9  ;;  %v7380_v9 = vld [vmem:[#allocation40_spill] sm:$0xff] }
 0x1b5   : > { %4567 = vmatmul.mubr.msk.bf16.gmra.mrb[20].mxu1 %vm854_vm0, %v7359_v6  ;;  %v7382_v6 = vpack.c.bf16 %v7380_v9, %v7381_v41  ;;  %v7400_v9 = vld [vmem:[#allocation67_spill] sm:$0xff]  ;;  %v7401_v41 = vpack.c.bf16 %v6214_v45, %v6201_v14 }
 0x1b6   : > { %4574 = vmatprep.mubr.msk.bf16.mxu1 %vm854_vm0, %v7361_v52  ;;  %v7384_v52 = vld [vmem:[#allocation42_spill] sm:$0xff]  ;;  %v7405_v14 = vld [vmem:[#allocation11_spill] sm:$0xff] }
 0x1b7   : > { %v7407_v45 = vpack.c.bf16 %v7405_v14, %v7406_v8 }
 0x1b9   : > { %4467 = vmatmul.mubr.msk.bf16.vlgmr.msra.gmra.mrb[32].mxu0 %vm854_vm0, %v7362_v47 }
 0x1ba   : > { %4470 = vmatprep.mubr.msk.bf16.mxu0 %vm854_vm0, %v7363_v12  ;;  %4499 = vmatpush3.bf16.msra.mxu0 %v5531_v58  ;;  %v5150_v58 = vld [vmem:[%s7175_s3 + $0x70] sm:$0xff]  }
 0x1bb   : > { %4500 = vmatprep.subr.bf16.mxu0 %v7364_v36 }
 0x1bd   : > { %4575 = vmatmul.mubr.msk.bf16.vlgmr.msra.gmra.mrb[24].mxu1 %vm854_vm0, %v7367_v40  ;;  %v7388_v40 = vld [vmem:[#allocation60_spill] sm:$0xff] }
 0x1be   : > { %4607 = vmatpush3.bf16.msra.mxu1 %v5148_v19  ;;  %4578 = vmatprep.mubr.msk.bf16.mxu1 %vm854_vm0, %v7370_v20  ;;  %v7373_v19 = vld [vmem:[#allocation33_spill] sm:$0xff]  ;;  %v7389_v18 = vpack.c.bf16 %v7388_v40, %v6064_v60  ;;  %v7422_v40 = vld [vmem:[#allocation43_spill] sm:$0xff] }
 0x1bf   : > { %4608 = vmatprep.subr.bf16.mxu1 %v5149_v39  ;;  %4501 = vmatpush3.bf16.msra.mxu0 %v7364_v36  ;;  %v7375_v38 = vpack.c.bf16 %v7373_v19, %v7374_v26  ;;  %v1293_v36 = vpack.c.bf16 %v6064_v60, %v7283_v33  ;;  %v7391_v20 = vld [vmem:[#allocation61_spill] sm:$0xff]  ;;  %v1297_v60 = vpack.c.bf16 %v6176_v42, %v7283_v33 }
 0x1c0   : > { %v7392_v30 = vpack.c.bf16 %v6138_v49, %v7391_v20  ;;  %v7398_v49 = vld [vmem:[#allocation66_spill] sm:$0xff]  ;;  %v7424_v20 = vld [vmem:[#allocation57_spill] sm:$0xff] }
 0x1c1   : > { %4471 = vmatmul.mubr.msk.bf16.gmra.mrb[36].mxu0 %vm854_vm0, %v7372_v7 }
 0x1c2   : > { %4474 = vmatprep.mubr.msk.bf16.mxu0 %vm854_vm0, %v1289_v57  ;;  %4609 = vmatpush3.bf16.msra.mxu1 %v5149_v39  ;;  %v7385_v39 = vpack.c.bf16 %v7383_v48, %v7384_v52  ;;  %v7393_v57 = vld [vmem:[#allocation64_spill] sm:$0xff]  ;;  %v5151_v52 = vld [vmem:[%s7175_s3 + $0x78] sm:$0xff]  }
 0x1c3   : > { %4642 = vmatprep.subr.bf16.mxu1 %v5150_v58  ;;  %v7395_v26 = vpack.c.bf16 %v7393_v57, %v7394_v2  ;;  %v2610_v57 = vpack.c.bf16 %v7283_v33, %v7357_v29  ;;  %v2834_v29 = vpack.c.bf16 %v7283_v33, %v6103_v15  ;;  %v2835_v15 = vpack.c.bf16 %v7283_v33, %v6182_v27 }
 0x1c5   : > { %4579 = vmatmul.mubr.msk.bf16.gmra.mrb[28].mxu1 %vm854_vm0, %v7375_v38  ;;  %v7396_v38 = vld [vmem:[#allocation65_spill] sm:$0xff] }
 0x1c6   : > { %4582 = vmatprep.mubr.msk.bf16.mxu1 %vm854_vm0, %v7377_v28  ;;  %v7399_v28 = vpack.c.bf16 %v7398_v49, %v6176_v42  ;;  %v7404_v42 = vld [vmem:[#allocation12_spill] sm:$0xff] }
 0x1c9   : > { %4475 = vmatmul.mubr.msk.bf16.gmra.mrb[40].mxu0 %vm854_vm0, %v7378_v43 }
 0x1ca   : > { %4478 = vmatprep.mubr.msk.bf16.mxu0 %vm854_vm0, %v7379_v55 }
 0x1cd   : > { %4583 = vmatmul.mubr.msk.bf16.gmra.mrb[0].mxu1 %vm854_vm0, %v7382_v6  ;;  %v7403_v6 = vld [vmem:[#allocation17_spill] sm:$0xff] }
 0x1ce   : > { %4586 = vmatprep.mubr.msk.bf16.mxu1 %vm854_vm0, %v7385_v39  ;;  %v1559_v48 = vpack.c.bf16 %v7404_v42, %v7403_v6  ;;  %v2608_v39 = vpack.c.bf16 %v7283_v33, %v5786_v5  ;;  %v2609_v5 = vpack.c.bf16 %v7283_v33, %v5921_v37  ;;  %v2833_v37 = vpack.c.bf16 %v7283_v33, %v7373_v19 }
 0x1d1   : > { %4479 = vmatmul.mubr.msk.bf16.gmra.mrb[44].mxu0 %vm854_vm0, %v7386_v50 }
 0x1d2   : > { %4482 = vmatprep.mubr.msk.bf16.mxu0 %vm854_vm0, %v1293_v36  ;;  %v7420_v36 = vld [vmem:[#allocation36_spill] sm:$0xff] }
 0x1d5   : > { %4587 = vmatmul.mubr.msk.bf16.gmra.mrb[4].mxu1 %vm854_vm0, %v7387_v25  ;;  %v7421_v25 = vld [vmem:[#allocation41_spill] sm:$0xff] }
 0x1d6   : > { %4590 = vmatprep.mubr.msk.bf16.mxu1 %vm854_vm0, %v7389_v18  ;;  %v7423_v18 = vld [vmem:[#allocation50_spill] sm:$0xff] }
 0x1d9   : > { %4483 = vmatmul.mubr.msk.bf16.gmra.mrb[48].mxu0 %vm854_vm0, %v7390_v32 }
 0x1da   : > { %4486 = vmatprep.mubr.msk.bf16.mxu0 %vm854_vm0, %v6155_v16 }
 0x1dd   : > { %4591 = vmatmul.mubr.msk.bf16.gmra.mrb[8].mxu1 %vm854_vm0, %v7392_v30  ;;  %v7425_v30 = vld [vmem:[#allocation58_spill] sm:$0xff] }
 0x1de   : > { %4594 = vmatprep.mubr.msk.bf16.mxu1 %vm854_vm0, %v7395_v26 }
 0x1e1   : > { %4487 = vmatmul.mubr.msk.bf16.gmra.mrb[52].mxu0 %vm854_vm0, %v7396_v38 }
 0x1e2   : > { %4490 = vmatprep.mubr.msk.bf16.mxu0 %vm854_vm0, %v1297_v60  ;;  %v2836_v60 = vpack.c.bf16 %v7283_v33, %v6244_v34 }
 0x1e5   : > { %4595 = vmatmul.mubr.msk.bf16.gmra.mrb[12].mxu1 %vm854_vm0, %v7397_v61 }
 0x1e6   : > { %4598 = vmatprep.mubr.msk.bf16.mxu1 %vm854_vm0, %v7399_v28 }
 0x1e9   : > { %4491 = vmatmul.mubr.msk.bf16.gmra.mrb[56].mxu0 %vm854_vm0, %v7400_v9 }
 0x1ea   : > { %4494 = vmatprep.mubr.msk.bf16.mxu0 %vm854_vm0, %v6226_v59 }
 0x1ed   : > { %4599 = vmatmul.mubr.msk.bf16.gmra.mrb[16].mxu1 %vm854_vm0, %v7401_v41 }
 0x1ee   : > { %4602 = vmatprep.mubr.msk.bf16.mxu1 %vm854_vm0, %v7402_v10 }
 0x1f1   : > { %4495 = vmatmul.mubr.msk.bf16.gmra.mrb[60].mxu0 %vm854_vm0, %v6240_v62 }
 0x1f2   : > { %4502 = vmatprep.mubr.msk.bf16.mxu0 %vm854_vm0, %v1559_v48 }
 0x1f5   : > { %4603 = vmatmul.mubr.msk.bf16.gmra.mrb[20].mxu1 %vm854_vm0, %v2122_v44  ;;  %v2384_v44 = vpack.c.bf16 %v7283_v33, %v7413_v24 }
 0x1f6   : > { %4610 = vmatprep.mubr.msk.bf16.mxu1 %vm854_vm0, %v5613_v35  ;;  %v5152_v35 = vld [vmem:[%s7175_s3 + $0x80] sm:$0xff]  }
 0x1f9   : > { %4503 = vmatmul.mubr.msk.bf16.vlgmr.msra.gmra.mrb[32].mxu0 %vm854_vm0, %v7407_v45 }
 0x1fa   : > { %4506 = vmatprep.mubr.msk.bf16.mxu0 %vm854_vm0, %v7408_v51 }
 0x1fd   : > { %4611 = vmatmul.mubr.msk.bf16.vlgmr.msra.gmra.mrb[24].mxu1 %vm854_vm0, %v7409_v13 }
 0x1fe   : > { %4643 = vmatpush3.bf16.msra.mxu1 %v5150_v58  ;;  %4614 = vmatprep.mubr.msk.bf16.mxu1 %vm854_vm0, %v5706_v22  ;;  %v7411_v22 = vld [vmem:[#allocation32_spill] sm:$0xff]  ;;  %v7419_v58 = vld [vmem:[#allocation31_spill] sm:$0xff] }
 0x1ff   : > { %4644 = vmatprep.subr.bf16.mxu1 %v5151_v52  ;;  %v2382_v53 = vpack.c.bf16 %v7283_v33, %v7411_v22  ;;  %v6654_v22 = vld [vmem:[%s7176_s4] ss:$0 sm:$0xff] }
 0x201   : > { %4507 = vmatmul.mubr.msk.bf16.gmra.mrb[36].mxu0 %vm854_vm0, %v7410_v0  ;;  %v5155_v0 = vld [vmem:[%s7177_s5 + $0x8] sm:$0xff]  }
 0x202   : > { %4645 = vmatpush3.bf16.msra.mxu1 %v5151_v52 }
 0x203   : > { %4678 = vmatprep.subr.bf16.mxu1 %v5152_v35 }
 0x205   : > { %4615 = vmatmul.mubr.msk.bf16.gmra.mrb[28].mxu1 %vm854_vm0, %v2381_v11 }
 0x206   : > { %4618 = vmatprep.mubr.msk.bf16.mxu1 %vm854_vm0, %v5769_v56  ;;  %v7412_v56 = vld [vmem:[#allocation44_spill] sm:$0xff] }
 0x20d   : > { %4619 = vmatmul.mubr.msk.bf16.gmra.mrb[0].mxu1 %vm854_vm0, %v5828_v63  ;;  %v2383_v63 = vpack.c.bf16 %v7283_v33, %v7412_v56 }
 0x20e   : > { %4622 = vmatprep.mubr.msk.bf16.mxu1 %vm854_vm0, %v7339_v4  ;;  %v7414_v4 = vld [vmem:[#allocation9_spill] sm:$0xff] }
 0x215   : > { %4623 = vmatmul.mubr.msk.bf16.gmra.mrb[4].mxu1 %vm854_vm0, %v2382_v53 }
 0x216   : > { %4626 = vmatprep.mubr.msk.bf16.mxu1 %vm854_vm0, %v7343_v17  ;;  %v5153_v17 = vld [vmem:[%s7175_s3 + $0x88] sm:$0xff]  }
 0x21d   : > { %4627 = vmatmul.mubr.msk.bf16.gmra.mrb[8].mxu1 %vm854_vm0, %v7344_v54  ;;  %v7415_v54 = vld [vmem:[#allocation16_spill] sm:$0xff] }
 0x21e   : > { %4630 = vmatprep.mubr.msk.bf16.mxu1 %vm854_vm0, %v7348_v21  ;;  %v7417_v21 = vld [vmem:[#allocation25_spill] sm:$0xff] }
 0x225   : > { %4631 = vmatmul.mubr.msk.bf16.gmra.mrb[12].mxu1 %vm854_vm0, %v2383_v63 }
 0x226   : > { %4634 = vmatprep.mubr.msk.bf16.mxu1 %vm854_vm0, %v7352_v31  ;;  %v7418_v31 = vld [vmem:[#allocation29_spill] sm:$0xff] }
 0x22d   : > { %4635 = vmatmul.mubr.msk.bf16.gmra.mrb[16].mxu1 %vm854_vm0, %v6095_v23  ;;  %v7416_v23 = vld [vmem:[#allocation19_spill] sm:$0xff] }
 0x22e   : > { %4638 = vmatprep.mubr.msk.bf16.mxu1 %vm854_vm0, %v6120_v1  ;;  %v2607_v1 = vpack.c.bf16 %v7283_v33, %v5636_v46  ;;  %v5154_v46 = vld [vmem:[%s7177_s5] sm:$0xff]  }
 0x22f   : > { %4714 = vmatprep.subr.bf16.mxu0 %v5154_v46 }
 0x230   : > { %4715 = vmatpush3.bf16.msra.mxu0 %v5154_v46 }
 0x231   : > { %4716 = vmatprep.subr.bf16.mxu0 %v5155_v0 }
 0x234   : > { %4717 = vmatpush3.bf16.msra.mxu0 %v5155_v0 }
 0x235   : > { %4639 = vmatmul.mubr.msk.bf16.gmra.mrb[20].mxu1 %vm854_vm0, %v2384_v44 }
 0x236   : > { %4646 = vmatprep.mubr.msk.bf16.mxu1 %vm854_vm0, %v7414_v4 }
 0x23d   : > { %4647 = vmatmul.mubr.msk.bf16.vlgmr.msra.gmra.mrb[24].mxu1 %vm854_vm0, %v7415_v54 }
 0x23e   : > { %4679 = vmatpush3.bf16.msra.mxu1 %v5152_v35  ;;  %4650 = vmatprep.mubr.msk.bf16.mxu1 %vm854_vm0, %v7416_v23 }
 0x23f   : > { %4680 = vmatprep.subr.bf16.mxu1 %v5153_v17 }
 0x242   : > { %4681 = vmatpush3.bf16.msra.mxu1 %v5153_v17 }
 0x245   : > { %4651 = vmatmul.mubr.msk.bf16.gmra.mrb[28].mxu1 %vm854_vm0, %v2607_v1 }
 0x246   : > { %4654 = vmatprep.mubr.msk.bf16.mxu1 %vm854_vm0, %v7417_v21 }
 0x24d   : > { %4655 = vmatmul.mubr.msk.bf16.gmra.mrb[0].mxu1 %vm854_vm0, %v7418_v31 }
 0x24e   : > { %4658 = vmatprep.mubr.msk.bf16.mxu1 %vm854_vm0, %v7419_v58 }
 0x255   : > { %4659 = vmatmul.mubr.msk.bf16.gmra.mrb[4].mxu1 %vm854_vm0, %v2608_v39 }
 0x256   : > { %4662 = vmatprep.mubr.msk.bf16.mxu1 %vm854_vm0, %v7420_v36 }
 0x25d   : > { %4663 = vmatmul.mubr.msk.bf16.gmra.mrb[8].mxu1 %vm854_vm0, %v7421_v25 }
 0x25e   : > { %4666 = vmatprep.mubr.msk.bf16.mxu1 %vm854_vm0, %v7422_v40 }
 0x265   : > { %4667 = vmatmul.mubr.msk.bf16.gmra.mrb[12].mxu1 %vm854_vm0, %v2609_v5 }
 0x266   : > { %4670 = vmatprep.mubr.msk.bf16.mxu1 %vm854_vm0, %v7423_v18 }
 0x26d   : > { %4671 = vmatmul.mubr.msk.bf16.gmra.mrb[16].mxu1 %vm854_vm0, %v7424_v20 }
 0x26e   : > { %4674 = vmatprep.mubr.msk.bf16.mxu1 %vm854_vm0, %v7425_v30 }
 0x275   : > { %4675 = vmatmul.mubr.msk.bf16.gmra.mrb[20].mxu1 %vm854_vm0, %v2610_v57 }
 0x276   : > { %4682 = vmatprep.mubr.msk.bf16.mxu1 %vm854_vm0, %v7362_v47 }
 0x27d   : > { %4683 = vmatmul.mubr.msk.bf16.vlgmr.msra.gmra.mrb[24].mxu1 %vm854_vm0, %v7363_v12 }
 0x27e   : > { %4686 = vmatprep.mubr.msk.bf16.mxu1 %vm854_vm0, %v7372_v7 }
 0x285   : > { %4687 = vmatmul.mubr.msk.bf16.gmra.mrb[28].mxu1 %vm854_vm0, %v2833_v37 }
 0x286   : > { %4690 = vmatprep.mubr.msk.bf16.mxu1 %vm854_vm0, %v7378_v43 }
 0x28d   : > { %4691 = vmatmul.mubr.msk.bf16.gmra.mrb[0].mxu1 %vm854_vm0, %v7379_v55 }
 0x28e   : > { %4694 = vmatprep.mubr.msk.bf16.mxu1 %vm854_vm0, %v7386_v50 }
 0x295   : > { %4695 = vmatmul.mubr.msk.bf16.gmra.mrb[4].mxu1 %vm854_vm0, %v2834_v29 }
 0x296   : > { %4698 = vmatprep.mubr.msk.bf16.mxu1 %vm854_vm0, %v7390_v32 }
 0x29c   : > { %v6584_v47 = vpop.f32.mrb[40].mxu0 }
 0x29d   : > { %v6586_v12 = vpop.f32.mrb[41].mxu0  ;;  %4699 = vmatmul.mubr.msk.bf16.gmra.mrb[8].mxu1 %vm854_vm0, %v6155_v16 }
 0x29e   : > { %v6590_v7 = vpop.f32.mrb[42].mxu0  ;;  %4702 = vmatprep.mubr.msk.bf16.mxu1 %vm854_vm0, %v7396_v38 }
 0x29f   : > { %v6594_v19 = vpop.f32.mrb[43].mxu0 }
 0x2a4   : > { %v6598_v43 = vpop.f32.mrb[44].mxu0 }
 0x2a5   : > { %v6600_v55 = vpop.f32.mrb[45].mxu0  ;;  %4703 = vmatmul.mubr.msk.bf16.gmra.mrb[12].mxu1 %vm854_vm0, %v2835_v15 }
 0x2a6   : > { %v6603_v50 = vpop.f32.mrb[46].mxu0  ;;  %4706 = vmatprep.mubr.msk.bf16.mxu1 %vm854_vm0, %v7400_v9 }
 0x2a7   : > { %v6607_v16 = vpop.f32.mrb[47].mxu0 }
 0x2ac   : > { %v6609_v32 = vpop.f32.mrb[48].mxu0 }
 0x2ad   : > { %v6611_v2 = vpop.f32.mrb[49].mxu0  ;;  %4707 = vmatmul.mubr.msk.bf16.gmra.mrb[16].mxu1 %vm854_vm0, %v6226_v59 }
 0x2ae   : > { %v6615_v27 = vpop.f32.mrb[50].mxu0  ;;  %4710 = vmatprep.mubr.msk.bf16.mxu1 %vm854_vm0, %v6240_v62 }
 0x2af   : > { %v6619_v26 = vpop.f32.mrb[51].mxu0 }
 0x2b4   : > { %v6623_v38 = vpop.f32.mrb[52].mxu0 }
 0x2b5   : > { %v6625_v61 = vpop.f32.mrb[53].mxu0  ;;  %4711 = vmatmul.mubr.msk.bf16.gmra.mrb[20].mxu1 %vm854_vm0, %v2836_v60 }
 0x2b6   : > { %v6628_v49 = vpop.f32.mrb[54].mxu0 }
 0x2b7   : > { %v6630_v28 = vpop.f32.mrb[55].mxu0 }
 0x2bc   : > { %v6632_v59 = vpop.f32.mrb[56].mxu0 }
 0x2bd   : > { %v6634_v9 = vpop.f32.mrb[57].mxu0 }
 0x2be   : > { %v6636_v62 = vpop.f32.mrb[58].mxu0 }
 0x2bf   : > { %v6638_v41 = vpop.f32.mrb[59].mxu0 }
 0x2c4   : > { %v6640_v10 = vpop.f32.mrb[60].mxu0 }
 0x2c5   : > { %v6642_v34 = vpop.f32.mrb[61].mxu0 }
 0x2c6   : > { %v6644_v6 = vpop.f32.mrb[62].mxu0 }
 0x2c7   : > { %v6646_v42 = vpop.f32.mrb[63].mxu0 }
 0x2cc   : > { %v4504_v48 = vpop.f32.mrb[32].mxu0 }
 0x2cd   : > { %v1674_v14 = vpop.f32.mrb[33].mxu0 }
 0x2ce   : > { %v4505_v8 = vpop.f32.mrb[34].mxu0 }
 0x2cf   : > { %v1677_v45 = vpop.f32.mrb[35].mxu0 }
 0x2d4   : > { %v4508_v51 = vpop.f32.mrb[36].mxu0 }
 0x2d5   : > { %v1690_v52 = vpop.f32.mrb[37].mxu0 }
 0x2d6   : > { %v4509_v13 = vpop.f32.mrb[38].mxu0 }
 0x2d7   : > { %v1693_v35 = vpop.f32.mrb[39].mxu0 }
 0x350   : > { %v4684_v11 = vpop.f32.mrb[24].mxu1 }
 0x351   : > { %v4818_v53 = vadd.f32 %v4684_v11, %v4504_v48  ;;  %v2900_v56 = vpop.f32.mrb[25].mxu1 }
 0x352   : > { %v4819_v63 = vadd.f32 %v2900_v56, %v1674_v14  ;;  %v4685_v24 = vpop.f32.mrb[26].mxu1 }
 0x353   : > { %v3068_v44 = vadd.f32 %v4818_v53, %v6654_v22  ;;  %v4820_v4 = vadd.f32 %v4685_v24, %v4505_v8  ;;  %v2903_v17 = vpop.f32.mrb[27].mxu1 }
 0x354   : > { %v3066_v54 = vadd.f32 %v4819_v63, %v6654_v22  ;;  %v4821_v23 = vadd.f32 %v2903_v17, %v1677_v45 }
 0x355   : > { %v3069_v1 = vadd.f32 %v4820_v4, %v6654_v22  ;;  %v3100_v31 = vmax.f32 %v3068_v44, 0.0 }
 0x356   : > { %v3067_v21 = vadd.f32 %v4821_v23, %v6654_v22  ;;  %v3098_v39 = vmax.f32 %v3066_v54, 0.0 }
 0x357   : > { %v3101_v58 = vmax.f32 %v3069_v1, 0.0 }
 0x358   : > { %v3099_v36 = vmax.f32 %v3067_v21, 0.0  ;;  %v4688_v46 = vpop.f32.mrb[28].mxu1 }
 0x359   : > { %v3131_v25 = vpack.c.bf16 %v3101_v58, %v3100_v31  ;;  %v4822_v40 = vadd.f32 %v4688_v46, %v4508_v51  ;;  %v2916_v5 = vpop.f32.mrb[29].mxu1 }
 0x35a   : > { %v3130_v18 = vpack.c.bf16 %v3099_v36, %v3098_v39  ;;  %v4823_v20 = vadd.f32 %v2916_v5, %v1690_v52  ;;  %v4689_v30 = vpop.f32.mrb[30].mxu1 }
 0x35b   : > { %v3072_v57 = vadd.f32 %v4822_v40, %v6654_v22  ;;  %v4824_v37 = vadd.f32 %v4689_v30, %v4509_v13  ;;  %v2919_v29 = vpop.f32.mrb[31].mxu1 }
 0x35c   : > { %v3070_v15 = vadd.f32 %v4823_v20, %v6654_v22  ;;  %v4825_v60 = vadd.f32 %v2919_v29, %v1693_v35  ;;  %4718 = vmatprep.mubr.msk.bf16.mxu0 %vm854_vm0, %v3130_v18 }
 0x35d   : > { %v3073_v48 = vadd.f32 %v4824_v37, %v6654_v22  ;;  %4719 = vmatmul.mubr.msk.bf16.vlgmr.msra.gmra.mrb[64].mxu0 %vm854_vm0, %v3131_v25  ;;  %v3104_v8 = vmax.f32 %v3072_v57, 0.0 }
 0x35e   : > { %v3071_v14 = vadd.f32 %v4825_v60, %v6654_v22  ;;  %v3102_v51 = vmax.f32 %v3070_v15, 0.0 }
 0x35f   : > { %v3105_v45 = vmax.f32 %v3073_v48, 0.0 }
 0x360   : > { %v3103_v52 = vmax.f32 %v3071_v14, 0.0  ;;  %v4692_v0 = vpop.f32.mrb[0].mxu1 }
 0x361   : > { %v3133_v11 = vpack.c.bf16 %v3105_v45, %v3104_v8  ;;  %v4826_v13 = vadd.f32 %v4692_v0, %v6584_v47  ;;  %v2932_v53 = vpop.f32.mrb[1].mxu1 }
 0x362   : > { %v3132_v56 = vpack.c.bf16 %v3103_v52, %v3102_v51  ;;  %v4827_v35 = vadd.f32 %v2932_v53, %v6586_v12  ;;  %v4693_v63 = vpop.f32.mrb[2].mxu1 }
 0x363   : > { %v3076_v24 = vadd.f32 %v4826_v13, %v6654_v22  ;;  %v4828_v44 = vadd.f32 %v4693_v63, %v6590_v7  ;;  %v2935_v4 = vpop.f32.mrb[3].mxu1 }
 0x364   : > { %v3074_v17 = vadd.f32 %v4827_v35, %v6654_v22  ;;  %v4829_v54 = vadd.f32 %v2935_v4, %v6594_v19  ;;  %4722 = vmatprep.mubr.msk.bf16.mxu0 %vm854_vm0, %v3132_v56 }
 0x365   : > { %v3077_v23 = vadd.f32 %v4828_v44, %v6654_v22  ;;  %4723 = vmatmul.mubr.msk.bf16.gmra.mrb[68].mxu0 %vm854_vm0, %v3133_v11  ;;  %v3108_v1 = vmax.f32 %v3076_v24, 0.0 }
 0x366   : > { %v3075_v47 = vadd.f32 %v4829_v54, %v6654_v22  ;;  %v3106_v21 = vmax.f32 %v3074_v17, 0.0 }
 0x367   : > { %v3109_v12 = vmax.f32 %v3077_v23, 0.0 }
 0x368   : > { %v3107_v31 = vmax.f32 %v3075_v47, 0.0  ;;  %v4696_v58 = vpop.f32.mrb[4].mxu1 }
 0x369   : > { %v3135_v39 = vpack.c.bf16 %v3109_v12, %v3108_v1  ;;  %v4830_v7 = vadd.f32 %v4696_v58, %v6598_v43  ;;  %v2948_v36 = vpop.f32.mrb[5].mxu1 }
 0x36a   : > { %v3134_v46 = vpack.c.bf16 %v3107_v31, %v3106_v21  ;;  %v4831_v19 = vadd.f32 %v2948_v36, %v6600_v55  ;;  %v4697_v25 = vpop.f32.mrb[6].mxu1 }
 0x36b   : > { %v3080_v40 = vadd.f32 %v4830_v7, %v6654_v22  ;;  %v4832_v5 = vadd.f32 %v4697_v25, %v6603_v50  ;;  %v2951_v18 = vpop.f32.mrb[7].mxu1 }
 0x36c   : > { %v3078_v20 = vadd.f32 %v4831_v19, %v6654_v22  ;;  %v4833_v30 = vadd.f32 %v2951_v18, %v6607_v16  ;;  %4726 = vmatprep.mubr.msk.bf16.mxu0 %vm854_vm0, %v3134_v46 }
 0x36d   : > { %v3081_v57 = vadd.f32 %v4832_v5, %v6654_v22  ;;  %4727 = vmatmul.mubr.msk.bf16.gmra.mrb[72].mxu0 %vm854_vm0, %v3135_v39  ;;  %v3112_v37 = vmax.f32 %v3080_v40, 0.0 }
 0x36e   : > { %v3079_v43 = vadd.f32 %v4833_v30, %v6654_v22  ;;  %v3110_v29 = vmax.f32 %v3078_v20, 0.0 }
 0x36f   : > { %v3113_v55 = vmax.f32 %v3081_v57, 0.0 }
 0x370   : > { %v3111_v15 = vmax.f32 %v3079_v43, 0.0  ;;  %v4700_v60 = vpop.f32.mrb[8].mxu1 }
 0x371   : > { %v3137_v48 = vpack.c.bf16 %v3113_v55, %v3112_v37  ;;  %v4834_v50 = vadd.f32 %v4700_v60, %v6609_v32  ;;  %v2964_v14 = vpop.f32.mrb[9].mxu1 }
 0x372   : > { %v3136_v8 = vpack.c.bf16 %v3111_v15, %v3110_v29  ;;  %v4835_v16 = vadd.f32 %v2964_v14, %v6611_v2  ;;  %v4701_v45 = vpop.f32.mrb[10].mxu1 }
 0x373   : > { %v3084_v51 = vadd.f32 %v4834_v50, %v6654_v22  ;;  %v4836_v52 = vadd.f32 %v4701_v45, %v6615_v27  ;;  %v2967_v0 = vpop.f32.mrb[11].mxu1 }
 0x374   : > { %v3082_v11 = vadd.f32 %v4835_v16, %v6654_v22  ;;  %v4837_v13 = vadd.f32 %v2967_v0, %v6619_v26  ;;  %4730 = vmatprep.mubr.msk.bf16.mxu0 %vm854_vm0, %v3136_v8 }
 0x375   : > { %v3085_v53 = vadd.f32 %v4836_v52, %v6654_v22  ;;  %4731 = vmatmul.mubr.msk.bf16.gmra.mrb[76].mxu0 %vm854_vm0, %v3137_v48  ;;  %v3116_v56 = vmax.f32 %v3084_v51, 0.0 }
 0x376   : > { %v3083_v32 = vadd.f32 %v4837_v13, %v6654_v22  ;;  %v3114_v35 = vmax.f32 %v3082_v11, 0.0 }
 0x377   : > { %v3117_v2 = vmax.f32 %v3085_v53, 0.0 }
 0x378   : > { %v3115_v63 = vmax.f32 %v3083_v32, 0.0  ;;  %v4704_v24 = vpop.f32.mrb[12].mxu1 }
 0x379   : > { %v3139_v44 = vpack.c.bf16 %v3117_v2, %v3116_v56  ;;  %v4838_v27 = vadd.f32 %v4704_v24, %v6623_v38  ;;  %v2980_v4 = vpop.f32.mrb[13].mxu1  ;;  %v5294_v2 = vmov 0.0|0.0   ;;  %v3439_v24 = vld [vmem:[%s7179_s7 + $0x20] sm:$0xff] }
 0x37a   : > { %v3138_v17 = vpack.c.bf16 %v3115_v63, %v3114_v35  ;;  %v4839_v26 = vadd.f32 %v2980_v4, %v6625_v61  ;;  %v4705_v54 = vpop.f32.mrb[14].mxu1  ;;  %4790 = vmatprep.subr.bf16.mxu0 %v5294_v2  ;;  %v3437_v35 = vld [vmem:[%s7179_s7 + $0x10] sm:$0xff]  ;;  %v3438_v63 = vld [vmem:[%s7179_s7 + $0x18] sm:$0xff] }
 0x37b   : > { %v3088_v23 = vadd.f32 %v4838_v27, %v6654_v22  ;;  %v4840_v47 = vadd.f32 %v4705_v54, %v6628_v49  ;;  %v2983_v1 = vpop.f32.mrb[15].mxu1  ;;  %v3440_v27 = vld [vmem:[%s7179_s7 + $0x28] sm:$0xff]  ;;  %v3443_v54 = vld [vmem:[%s7179_s7 + $0x40] sm:$0xff] }
 0x37c   : > { %v3086_v12 = vadd.f32 %v4839_v26, %v6654_v22  ;;  %v4841_v21 = vadd.f32 %v2983_v1, %v6630_v28  ;;  %4734 = vmatprep.mubr.msk.bf16.mxu0 %vm854_vm0, %v3138_v17  ;;  %v4797_v4 = vpack.c.bf16 %v3440_v27, %v3439_v24  ;;  %v3441_v17 = vld [vmem:[%s7179_s7 + $0x30] sm:$0xff]  ;;  %v3442_v26 = vld [vmem:[%s7179_s7 + $0x38] sm:$0xff] }
 0x37d   : > { %v3089_v31 = vadd.f32 %v4840_v47, %v6654_v22  ;;  %4735 = vmatmul.mubr.msk.bf16.gmra.mrb[80].mxu0 %vm854_vm0, %v3139_v44  ;;  %v3120_v58 = vmax.f32 %v3088_v23, 0.0  ;;  %v4794_v44 = vpack.c.bf16 %v3438_v63, %v3437_v35  ;;  %v4800_v23 = vpack.c.bf16 %v3442_v26, %v3441_v17  ;;  %v3444_v47 = vld [vmem:[%s7179_s7 + $0x48] sm:$0xff] }
 0x37e   : > { %v3087_v38 = vadd.f32 %v4841_v21, %v6654_v22  ;;  %v3118_v39 = vmax.f32 %v3086_v12, 0.0  ;;  %v4803_v1 = vpack.c.bf16 %v3444_v47, %v3443_v54  ;;  %v3445_v12 = vld [vmem:[%s7179_s7 + $0x50] sm:$0xff]  ;;  %v3446_v21 = vld [vmem:[%s7179_s7 + $0x58] sm:$0xff] }
 0x37f   : > { %v3121_v61 = vmax.f32 %v3089_v31, 0.0  ;;  %v3447_v31 = vld [vmem:[%s7179_s7 + $0x60] sm:$0xff] }
 0x380   : > { %v3119_v7 = vmax.f32 %v3087_v38, 0.0  ;;  %v4708_v36 = vpop.f32.mrb[16].mxu1  ;;  %v4806_v38 = vpack.c.bf16 %v3446_v21, %v3445_v12 }
 0x381   : > { %v3141_v46 = vpack.c.bf16 %v3121_v61, %v3120_v58  ;;  %v4842_v49 = vadd.f32 %v4708_v36, %v6632_v59  ;;  %v2996_v19 = vpop.f32.mrb[17].mxu1  ;;  %v3448_v58 = vld [vmem:[%s7179_s7 + $0x68] sm:$0xff] }
 0x382   : > { %v3140_v25 = vpack.c.bf16 %v3119_v7, %v3118_v39  ;;  %v4843_v28 = vadd.f32 %v2996_v19, %v6634_v9  ;;  %v4709_v40 = vpop.f32.mrb[18].mxu1  ;;  %v4809_v61 = vpack.c.bf16 %v3448_v58, %v3447_v31  ;;  %v3449_v39 = vld [vmem:[%s7179_s7 + $0x70] sm:$0xff]  ;;  %v3450_v7 = vld [vmem:[%s7179_s7 + $0x78] sm:$0xff] }
 0x383   : > { %v3092_v5 = vadd.f32 %v4842_v49, %v6654_v22  ;;  %v4844_v18 = vadd.f32 %v4709_v40, %v6636_v62  ;;  %v2999_v20 = vpop.f32.mrb[19].mxu1  ;;  %v4812_v36 = vpack.c.bf16 %v3450_v7, %v3449_v39 }
 0x384   : > { %v3090_v30 = vadd.f32 %v4843_v28, %v6654_v22  ;;  %v4845_v57 = vadd.f32 %v2999_v20, %v6638_v41  ;;  %4738 = vmatprep.mubr.msk.bf16.mxu0 %vm854_vm0, %v3140_v25 }
 0x385   : > { %v3093_v43 = vadd.f32 %v4844_v18, %v6654_v22  ;;  %4739 = vmatmul.mubr.msk.bf16.gmra.mrb[84].mxu0 %vm854_vm0, %v3141_v46  ;;  %v3124_v37 = vmax.f32 %v3092_v5, 0.0 }
 0x386   : > { %v3091_v59 = vadd.f32 %v4845_v57, %v6654_v22  ;;  %v3122_v55 = vmax.f32 %v3090_v30, 0.0 }
 0x387   : > { %v3125_v9 = vmax.f32 %v3093_v43, 0.0  ;;  %v6782_v43 = vld [vmem:[%s7178_s6] ss:$0 sm:$0xff] }
 0x388   : > { %v3123_v29 = vmax.f32 %v3091_v59, 0.0  ;;  %v4712_v15 = vpop.f32.mrb[20].mxu1 }
 0x389   : > { %v3143_v60 = vpack.c.bf16 %v3125_v9, %v3124_v37  ;;  %v4846_v62 = vadd.f32 %v4712_v15, %v6640_v10  ;;  %v3012_v48 = vpop.f32.mrb[21].mxu1 }
 0x38a   : > { %v3142_v50 = vpack.c.bf16 %v3123_v29, %v3122_v55  ;;  %v4847_v41 = vadd.f32 %v3012_v48, %v6642_v34  ;;  %v4713_v14 = vpop.f32.mrb[22].mxu1 }
 0x38b   : > { %v3096_v8 = vadd.f32 %v4846_v62, %v6654_v22  ;;  %v4848_v16 = vadd.f32 %v4713_v14, %v6644_v6  ;;  %v3015_v45 = vpop.f32.mrb[23].mxu1  ;;  %v3435_v6 = vld [vmem:[%s7179_s7] sm:$0xff] }
 0x38c   : > { %v3094_v51 = vadd.f32 %v4847_v41, %v6654_v22  ;;  %v4849_v52 = vadd.f32 %v3015_v45, %v6646_v42  ;;  %4742 = vmatprep.mubr.msk.bf16.mxu0 %vm854_vm0, %v3142_v50  ;;  %v3436_v42 = vld [vmem:[%s7179_s7 + $0x8] sm:$0xff] }
 0x38d   : > { %v3097_v0 = vadd.f32 %v4848_v16, %v6654_v22  ;;  %4743 = vmatmul.mubr.msk.bf16.gmra.mrb[88].mxu0 %vm854_vm0, %v3143_v60  ;;  %v3128_v11 = vmax.f32 %v3096_v8, 0.0 }
 0x38e   : > { %v3095_v10 = vadd.f32 %v4849_v52, %v6654_v22  ;;  %v3126_v13 = vmax.f32 %v3094_v51, 0.0  ;;  %v4791_v22 = vpack.c.bf16 %v3436_v42, %v3435_v6 }
 0x38f   : > { %v3129_v34 = vmax.f32 %v3097_v0, 0.0 }
 0x390   : > { %v3127_v53 = vmax.f32 %v3095_v10, 0.0  ;;  %4792 = vmatpush3.bf16.msra.mxu0 %v4791_v22 }
 0x391   : > { %v3145_v32 = vpack.c.bf16 %v3129_v34, %v3128_v11  ;;  %4793 = vmatprep.subr.bf16.mxu0 %v5294_v2 }
 0x392   : > { %v3144_v56 = vpack.c.bf16 %v3127_v53, %v3126_v13 }
 0x394   : > { %4746 = vmatprep.mubr.msk.bf16.mxu0 %vm854_vm0, %v3144_v56  ;;  %4795 = vmatpush3.bf16.msra.mxu0 %v4794_v44 }
 0x395   : > { %4747 = vmatmul.mubr.msk.bf16.gmra.mrb[92].mxu0 %vm854_vm0, %v3145_v32  ;;  %4796 = vmatprep.subr.bf16.mxu0 %v5294_v2 }
 0x396   : > { %4782 = vmatprep.mubr.msk.f32.mxu0 %vm5295_vm3, %v7283_v33 }
 0x398   : > { %4798 = vmatpush3.bf16.msra.mxu0 %v4797_v4 }
 0x399   : > { %4799 = vmatprep.subr.bf16.mxu0 %v5294_v2 }
 0x39c   : > { %4801 = vmatpush3.bf16.msra.mxu0 %v4800_v23 }
 0x39d   : > { %4802 = vmatprep.subr.bf16.mxu0 %v5294_v2 }
 0x3a0   : > { %4804 = vmatpush3.bf16.msra.mxu0 %v4803_v1 }
 0x3a1   : > { %4805 = vmatprep.subr.bf16.mxu0 %v5294_v2 }
 0x3a4   : > { %4807 = vmatpush3.bf16.msra.mxu0 %v4806_v38 }
 0x3a5   : > { %4808 = vmatprep.subr.bf16.mxu0 %v5294_v2 }
 0x3a8   : > { %4810 = vmatpush3.bf16.msra.mxu0 %v4809_v61 }
 0x3a9   : > { %4811 = vmatprep.subr.bf16.mxu0 %v5294_v2 }
 0x3ac   : > { %4813 = vmatpush3.bf16.msra.mxu0 %v4812_v36 }
 0x3ad   : > { %4785 = vmatprep.subr.mxu0 %v7283_v33 }
 0x430   : > { %v4720_v46 = vpop.f32.mrb[64].mxu0 }
 0x431   : > { %v3251_v49 = vpop.f32.mrb[65].mxu0  ;;  %v6804_v8 = vadd.f32 %v4720_v46, %v6782_v43 }
 0x432   : > { %v4721_v19 = vpop.f32.mrb[66].mxu0  ;;  %v6794_v29 = vadd.f32 %v6782_v43, %v3251_v49 }
 0x433   : > { %v3254_v25 = vpop.f32.mrb[67].mxu0  ;;  %v6812_v52 = vadd.f32 %v4721_v19, %v6782_v43 }
 0x434   : > { %v6788_v9 = vadd.f32 %v6782_v43, %v3254_v25 }
 0x436   : > { %v3378_v48 = vadd.f32 %v6788_v9, %v6794_v29 }
 0x438   : > { %v4724_v28 = vpop.f32.mrb[68].mxu0  ;;  %v3379_v45 = vadd.f32 %v3378_v48, %v6804_v8 }
 0x439   : > { %v3267_v40 = vpop.f32.mrb[69].mxu0  ;;  %v6855_v38 = vadd.f32 %v4724_v28, %v6782_v43 }
 0x43a   : > { %v4725_v5 = vpop.f32.mrb[70].mxu0  ;;  %v6819_v13 = vadd.f32 %v6782_v43, %v3267_v40  ;;  %v3380_v53 = vadd.f32 %v3379_v45, %v6812_v52 }
 0x43b   : > { %v3270_v18 = vpop.f32.mrb[71].mxu0  ;;  %v6871_v19 = vadd.f32 %v4725_v5, %v6782_v43 }
 0x43c   : > { %v3381_v35 = vadd.f32 %v3380_v53, %v6819_v13  ;;  %v6834_v63 = vadd.f32 %v6782_v43, %v3270_v18 }
 0x43e   : > { %v3382_v23 = vadd.f32 %v3381_v35, %v6834_v63 }
 0x440   : > { %v4728_v20 = vpop.f32.mrb[72].mxu0  ;;  %v3383_v7 = vadd.f32 %v3382_v23, %v6855_v38 }
 0x441   : > { %v3283_v30 = vpop.f32.mrb[73].mxu0  ;;  %v6801_v50 = vadd.f32 %v4728_v20, %v6782_v43 }
 0x442   : > { %v4729_v57 = vpop.f32.mrb[74].mxu0  ;;  %v6791_v55 = vadd.f32 %v6782_v43, %v3283_v30  ;;  %v3384_v30 = vadd.f32 %v3383_v7, %v6871_v19 }
 0x443   : > { %v3286_v59 = vpop.f32.mrb[75].mxu0  ;;  %v6809_v51 = vadd.f32 %v4729_v57, %v6782_v43 }
 0x444   : > { %v6785_v37 = vadd.f32 %v6782_v43, %v3286_v59 }
 0x446   : > { %v3391_v15 = vadd.f32 %v6785_v37, %v6791_v55 }
 0x448   : > { %v4732_v60 = vpop.f32.mrb[76].mxu0  ;;  %v3392_v16 = vadd.f32 %v3391_v15, %v6801_v50 }
 0x449   : > { %v3299_v62 = vpop.f32.mrb[77].mxu0  ;;  %v6848_v47 = vadd.f32 %v4732_v60, %v6782_v43 }
 0x44a   : > { %v4733_v41 = vpop.f32.mrb[78].mxu0  ;;  %v6815_v0 = vadd.f32 %v6782_v43, %v3299_v62  ;;  %v3393_v10 = vadd.f32 %v3392_v16, %v6809_v51 }
 0x44b   : > { %v3302_v14 = vpop.f32.mrb[79].mxu0  ;;  %v6864_v36 = vadd.f32 %v4733_v41, %v6782_v43  ;;  %v3385_v41 = vrot.slane %v3384_v30, 4 }
 0x44c   : > { %v3394_v6 = vadd.f32 %v3393_v10, %v6815_v0  ;;  %v6824_v42 = vadd.f32 %v6782_v43, %v3302_v14 }
 0x44e   : > { %v3395_v27 = vadd.f32 %v3394_v6, %v6824_v42 }
 0x450   : > { %v4736_v11 = vpop.f32.mrb[80].mxu0  ;;  %v3396_v58 = vadd.f32 %v3395_v27, %v6848_v47 }
 0x451   : > { %v3315_v34 = vpop.f32.mrb[81].mxu0  ;;  %v6837_v24 = vadd.f32 %v4736_v11, %v6782_v43 }
 0x452   : > { %v4737_v32 = vpop.f32.mrb[82].mxu0  ;;  %v6827_v2 = vadd.f32 %v6782_v43, %v3315_v34  ;;  %v3397_v25 = vadd.f32 %v3396_v58, %v6864_v36 }
 0x453   : > { %v3318_v56 = vpop.f32.mrb[83].mxu0  ;;  %v6843_v4 = vadd.f32 %v4737_v32, %v6782_v43 }
 0x454   : > { %v6830_v22 = vadd.f32 %v6782_v43, %v3318_v56  ;;  %v3398_v60 = vrot.slane %v3397_v25, 4  ;;  %v3386_v56 = vadd.f32 %v3385_v41, %v3384_v30 }
 0x456   : > { %v3404_v44 = vadd.f32 %v6830_v22, %v6827_v2  ;;  %v3399_v45 = vadd.f32 %v3398_v60, %v3397_v25 }
 0x458   : > { %v3405_v17 = vadd.f32 %v3404_v44, %v6837_v24  ;;  %v4740_v26 = vpop.f32.mrb[84].mxu0 }
 0x459   : > { %v3331_v54 = vpop.f32.mrb[85].mxu0  ;;  %v6867_v46 = vadd.f32 %v4740_v26, %v6782_v43 }
 0x45a   : > { %v6851_v1 = vadd.f32 %v6782_v43, %v3331_v54  ;;  %v3406_v12 = vadd.f32 %v3405_v17, %v6843_v4  ;;  %v4741_v21 = vpop.f32.mrb[86].mxu0  ;;  %v3400_v17 = vrot.slane %v3399_v45, 2 }
 0x45b   : > { %v3334_v31 = vpop.f32.mrb[87].mxu0  ;;  %v6875_v28 = vadd.f32 %v4741_v21, %v6782_v43 }
 0x45c   : > { %v3407_v61 = vadd.f32 %v3406_v12, %v6851_v1  ;;  %v6860_v39 = vadd.f32 %v6782_v43, %v3334_v31  ;;  %v3387_v12 = vrot.slane %v3386_v56, 2  ;;  %v3401_v58 = vadd.f32 %v3400_v17, %v3399_v45 }
 0x45e   : > { %v3408_v49 = vadd.f32 %v3407_v61, %v6860_v39  ;;  %v3388_v25 = vadd.f32 %v3387_v12, %v3386_v56 }
 0x460   : > { %v3409_v40 = vadd.f32 %v3408_v49, %v6867_v46  ;;  %v4744_v18 = vpop.f32.mrb[88].mxu0 }
 0x461   : > { %v3347_v20 = vpop.f32.mrb[89].mxu0  ;;  %v6887_v14 = vadd.f32 %v4744_v18, %v6782_v43  ;;  %v3402_v18 = vrot.slane %v3401_v58, 1 }
 0x462   : > { %v3410_v57 = vadd.f32 %v3409_v40, %v6875_v28  ;;  %v4745_v59 = vpop.f32.mrb[90].mxu0  ;;  %v6881_v62 = vadd.f32 %v6782_v43, %v3347_v20 }
 0x463   : > { %v3350_v15 = vpop.f32.mrb[91].mxu0  ;;  %v6892_v10 = vadd.f32 %v4745_v59, %v6782_v43 }
 0x464   : > { %v6884_v5 = vadd.f32 %v6782_v43, %v3350_v15  ;;  %v3411_v48 = vrot.slane %v3410_v57, 4  ;;  %v3403_v15 = vadd.f32 %v3402_v18, %v3401_v58 }
 0x466   : > { %v3417_v16 = vadd.f32 %v6884_v5, %v6881_v62  ;;  %v3412_v53 = vadd.f32 %v3411_v48, %v3410_v57  ;;  %v3389_v57 = vrot.slane %v3388_v25, 1  ;;  %v3432_v45 = vmul.f32 0.015625, %v3403_v15 }
 0x468   : > { %v3418_v11 = vadd.f32 %v3417_v16, %v6887_v14  ;;  %v4748_v34 = vpop.f32.mrb[92].mxu0  ;;  %v3413_v23 = vrot.slane %v3412_v53, 2  ;;  %v3390_v41 = vadd.f32 %v3389_v57, %v3388_v25 }
 0x469   : > { %v3363_v32 = vpop.f32.mrb[93].mxu0  ;;  %v6904_v21 = vadd.f32 %v4748_v34, %v6782_v43 }
 0x46a   : > { %v6896_v6 = vadd.f32 %v6782_v43, %v3363_v32  ;;  %v3419_v35 = vadd.f32 %v3418_v11, %v6892_v10  ;;  %v4749_v44 = vpop.f32.mrb[94].mxu0  ;;  %v3414_v49 = vadd.f32 %v3413_v23, %v3412_v53  ;;  %v3431_v34 = vmul.f32 0.015625, %v3390_v41 }
 0x46b   : > { %v3366_v27 = vpop.f32.mrb[95].mxu0  ;;  %v6908_v61 = vadd.f32 %v4749_v44, %v6782_v43  ;;  %v3533_v44 = vld [vmem:[%s7180_s8] sm:$0xff] }
 0x46c   : > { %v3420_v26 = vadd.f32 %v3419_v35, %v6896_v6  ;;  %v6901_v54 = vadd.f32 %v6782_v43, %v3366_v27  ;;  %v3415_v30 = vrot.slane %v3414_v49, 1  ;;  %v3456_v56 = vsel %vm3455_vm4, %v3432_v45, %v3431_v34 }
 0x46e   : > { %v3421_v31 = vadd.f32 %v3420_v26, %v6901_v54  ;;  %v3416_v48 = vadd.f32 %v3415_v30, %v3414_v49 }
 0x470   : > { %v3422_v7 = vadd.f32 %v3421_v31, %v6904_v21  ;;  %v3433_v43 = vmul.f32 0.015625, %v3416_v48 }
 0x472   : > { %v3423_v40 = vadd.f32 %v3422_v7, %v6908_v61  ;;  %v3458_v35 = vsel %vm3457_vm5, %v3433_v43, %v3456_v56 }
 0x474   : > { %v3424_v20 = vrot.slane %v3423_v40, 4 }
 0x476   : > { %v3425_v59 = vadd.f32 %v3424_v20, %v3423_v40  ;;  %v5296_v40 = vmov 1966171168  }
 0x477   : > { %v3616_v18 = vunpack.c.l.s4 %v5296_v40  ;;  %v5168_v40 = vld [vmem:[%s5460_s19 + $0x40] sm:$0xff] }
 0x478   : > { %v3426_v60 = vrot.slane %v3425_v59, 2 }
 0x479   : > { %v3617_v20 = vunpack.c.0.s8 %v3616_v18 }
 0x47a   : > { %v3427_v16 = vadd.f32 %v3426_v60, %v3425_v59  ;;  %v3641_v59 = vsub.s32 0, %v5557_v3 }
 0x47b   : > { %v3620_v30 = vsub.s32 %v3617_v20, %v5557_v3  ;;  %v5169_v20 = vld [vmem:[%s5460_s19 + $0x48] sm:$0xff] }
 0x47c   : > { %v3428_v11 = vrot.slane %v3427_v16, 1 }
 0x47e   : > { %v3429_v32 = vadd.f32 %v3428_v11, %v3427_v16 }
 0x480   : > { %v3434_v53 = vmul.f32 0.015625, %v3429_v32 }
 0x482   : > { %v3460_v27 = vsel %vm3459_vm6, %v3434_v53, %v3458_v35 }
 0x483   : > { %4783 = vmatmul.mubr.f32.vlgmr.msra.gmra.mrb[96].mxu0 %v3460_v27 }
 0x484   : > { %4786 = vmatpush3.msra.mxu0 %v3533_v44  ;;  %4787 = vmatprep.mubr.msk.f32.mxu0 %vm5295_vm3, %v7283_v33 }
 0x556   : > { %v3528_v17 = vpop.f32.mrb[96].mxu0 }
 0x557   : > { %v3532_v26 = vmax.f32 %v3528_v17, 0.0  ;;  %v4784_v23 = vpop.f32.mrb[97].mxu0 }
 0x559   : > { %4788 = vmatmul.mubr.msk.f32.vlgmr.msra.gmra.mrb[98].mxu0 %vm3534_vm7, %v3532_v26 }
 0x62c   : > { %v3604_v12 = vpop.f32.mrb[98].mxu0 }
 0x62d   : > { %v3608_v31 = vsub.f32 0.0, %v3604_v12  ;;  %v4789_v58 = vpop.f32.mrb[99].mxu0  ;;  %v5165_v12 = vld [vmem:[%s5460_s19 + $0x28] sm:$0xff] }
 0x62e   : > { %v5166_v58 = vld [vmem:[%s5460_s19 + $0x30] sm:$0xff] }
 0x62f   : > { %v3609_v7 = vmul.f32 1.442695, %v3608_v31 }
 0x631   : > { %5156 = vpow2.f32 %v3609_v7 }
 0x63b   : > { %v5157_v49 = vpop.eup %5156 }
 0x63c   : > { %v3611_v25 = vadd.f32 1.0, %v5157_v49  ;;  %v5167_v49 = vld [vmem:[%s5460_s19 + $0x38] sm:$0xff] }
 0x63e   : > { %5158 = vrcp.f32 %v3611_v25 }
 0x648   : > { %v5159_v57 = vpop.eup %5158 }
 0x649   : > { %v3621_v33 = vrot.slane %v5159_v57, %v3620_v30  ;;  %v5170_v57 = vld [vmem:[%s5460_s19 + $0x50] sm:$0xff] }
 0x64b   : > { %v3622_v15 = vcombine.high %v3621_v33, %v3621_v33  ;;  %v3629_v60 = vrot.slane %v3621_v33, %v3620_v30 }
 0x64d   : > { %v3636_v48 = vrot.slane %v3622_v15, %v3620_v30  ;;  %v3637_v41 = vcombine.high %v3629_v60, %v3629_v60  ;;  %v3642_v16 = vrot.slane %v3629_v60, %v3641_v59  ;;  %v5172_v60 = vld [vmem:[%s5460_s19 + $0x60] sm:$0xff] }
 0x64f   : > { %v3638_v45 = vcombine.high %v3636_v48, %v3636_v48  ;;  %v3646_v11 = vrot.slane %v3636_v48, %v3641_v59  ;;  %v3650_v43 = vrot.slane %v3637_v41, %v3641_v59  ;;  %v3659_v34 = vmul.f32 %v3642_v16, %v6794_v29  ;;  %v5173_v41 = vld [vmem:[%s5460_s19 + $0x68] sm:$0xff] }
 0x650   : > { %v3660_v32 = vmul.f32 %v3642_v16, %v6788_v9  ;;  %v3661_v53 = vmul.f32 %v3642_v16, %v6804_v8  ;;  %v3662_v56 = vmul.f32 %v3642_v16, %v6812_v52  ;;  %v3663_v35 = vmul.f32 %v3642_v16, %v6819_v13 }
 0x651   : > { %v3654_v44 = vrot.slane %v3638_v45, %v3641_v59  ;;  %v3664_v3 = vmul.f32 %v3642_v16, %v6834_v63  ;;  %v3665_v27 = vmul.f32 %v3642_v16, %v6855_v38  ;;  %v3666_v17 = vmul.f32 %v3642_v16, %v6871_v19  ;;  %v5171_v59 = vld [vmem:[%s5460_s19 + $0x58] sm:$0xff]  ;;  %v5174_v45 = vld [vmem:[%s5460_s19 + $0x70] sm:$0xff] }
 0x652   : > { %v3667_v26 = vmul.f32 %v3646_v11, %v6791_v55  ;;  %v3668_v23 = vmul.f32 %v3646_v11, %v6785_v37  ;;  %v3669_v29 = vmul.f32 %v3646_v11, %v6801_v50  ;;  %v3670_v9 = vmul.f32 %v3646_v11, %v6809_v51 }
 0x653   : > { %v3671_v8 = vmul.f32 %v3646_v11, %v6815_v0  ;;  %v3672_v52 = vmul.f32 %v3646_v11, %v6824_v42  ;;  %v3673_v13 = vmul.f32 %v3646_v11, %v6848_v47  ;;  %v3674_v63 = vmul.f32 %v3646_v11, %v6864_v36 }
 0x654   : > { %v3675_v38 = vmul.f32 %v3650_v43, %v6827_v2  ;;  %v3676_v19 = vmul.f32 %v3650_v43, %v6830_v22  ;;  %v3677_v55 = vmul.f32 %v3650_v43, %v6837_v24  ;;  %v3678_v37 = vmul.f32 %v3650_v43, %v6843_v4 }
 0x655   : > { %v3679_v50 = vmul.f32 %v3650_v43, %v6851_v1  ;;  %v3680_v51 = vmul.f32 %v3650_v43, %v6860_v39  ;;  %v3681_v0 = vmul.f32 %v3650_v43, %v6867_v46  ;;  %v3682_v42 = vmul.f32 %v3650_v43, %v6875_v28  ;;  %v5160_v46 = vld [vmem:[%s5460_s19] sm:$0xff]  ;;  %v5175_v43 = vld [vmem:[%s5460_s19 + $0x78] sm:$0xff] }
 0x656   : > { %v3683_v2 = vmul.f32 %v3654_v44, %v6881_v62  ;;  %v3684_v22 = vmul.f32 %v3654_v44, %v6884_v5  ;;  %v3685_v24 = vmul.f32 %v3654_v44, %v6887_v14  ;;  %v3686_v4 = vmul.f32 %v3654_v44, %v6892_v10  ;;  %v5161_v62 = vld [vmem:[%s5460_s19 + $0x8] sm:$0xff]  ;;  %v5162_v14 = vld [vmem:[%s5460_s19 + $0x10] sm:$0xff] }
 0x657   : > { %v3687_v47 = vmul.f32 %v3654_v44, %v6896_v6  ;;  %v3688_v1 = vmul.f32 %v3654_v44, %v6901_v54  ;;  %v6950_v39 = vmul.f32 %v3654_v44, %v6904_v21  ;;  %v6953_v36 = vmul.f32 %v3654_v44, %v6908_v61  ;;  %v5163_v6 = vld [vmem:[%s5460_s19 + $0x18] sm:$0xff]  ;;  %v5164_v21 = vld [vmem:[%s5460_s19 + $0x20] sm:$0xff]  ;;  %v5178_v44 = vld [vmem:[%s5460_s19 + $0x90] sm:$0xff] }
 0x658   : > { %v6956_v28 = vadd.f32 %v5160_v46, %v3659_v34  ;;  %v6959_v5 = vadd.f32 %v5161_v62, %v3660_v32  ;;  %v6962_v10 = vadd.f32 %v5162_v14, %v3661_v53  ;;  %v6965_v54 = vadd.f32 %v5163_v6, %v3662_v56  ;;  %v5176_v32 = vld [vmem:[%s5460_s19 + $0x80] sm:$0xff]  ;;  %v5177_v56 = vld [vmem:[%s5460_s19 + $0x88] sm:$0xff]  ;;  %v5187_v62 = vld [vmem:[%s5460_s19 + $0xd8] sm:$0xff] }
 0x659   : > { %v6968_v61 = vadd.f32 %v5164_v21, %v3663_v35  ;;  %v6971_v31 = vadd.f32 %v5165_v12, %v3664_v3  ;;  %v6974_v7 = vadd.f32 %v5166_v58, %v3665_v27  ;;  %v6977_v25 = vadd.f32 %v5167_v49, %v3666_v17  ;;  %v5179_v27 = vld [vmem:[%s5460_s19 + $0x98] sm:$0xff]  ;;  %v5188_v14 = vld [vmem:[%s5460_s19 + $0xe0] sm:$0xff] }
 0x65a   : > { %v6980_v18 = vadd.f32 %v5168_v40, %v3667_v26  ;;  %v6983_v30 = vadd.f32 %v5169_v20, %v3668_v23  ;;  %v6986_v33 = vadd.f32 %v5170_v57, %v3669_v29  ;;  %v6989_v15 = vadd.f32 %v5171_v59, %v3670_v9  ;;  %v5180_v26 = vld [vmem:[%s5460_s19 + $0xa0] sm:$0xff]  ;;  %v5181_v29 = vld [vmem:[%s5460_s19 + $0xa8] sm:$0xff]  ;;  %v5191_v12 = vld [vmem:[%s5460_s19 + $0xf8] sm:$0xff] }
 0x65b   : > { %v6992_v48 = vadd.f32 %v5172_v60, %v3671_v8  ;;  %v6995_v16 = vadd.f32 %v5173_v41, %v3672_v52  ;;  %v6998_v11 = vadd.f32 %v5174_v45, %v3673_v13  ;;  %v7001_v34 = vadd.f32 %v5175_v43, %v3674_v63  ;;  %v5182_v8 = vld [vmem:[%s5460_s19 + $0xb0] sm:$0xff]  ;;  %v5183_v13 = vld [vmem:[%s5460_s19 + $0xb8] sm:$0xff] }
 0x65c   : > { %v7004_v53 = vadd.f32 %v5176_v32, %v3675_v38  ;;  %v7007_v35 = vadd.f32 %v5177_v56, %v3676_v19  ;;  %v7010_v3 = vadd.f32 %v5178_v44, %v3677_v55  ;;  %v7013_v17 = vadd.f32 %v5179_v27, %v3678_v37  ;;  %v5184_v38 = vld [vmem:[%s5460_s19 + $0xc0] sm:$0xff]  ;;  %v5185_v55 = vld [vmem:[%s5460_s19 + $0xc8] sm:$0xff] }
 0x65d   : > { %v7016_v23 = vadd.f32 %v5180_v26, %v3679_v50  ;;  %v7019_v9 = vadd.f32 %v5181_v29, %v3680_v51  ;;  %v7022_v52 = vadd.f32 %v5182_v8, %v3681_v0  ;;  %v7025_v63 = vadd.f32 %v5183_v13, %v3682_v42  ;;  %v5186_v50 = vld [vmem:[%s5460_s19 + $0xd0] sm:$0xff]  ;;  %v5189_v0 = vld [vmem:[%s5460_s19 + $0xe8] sm:$0xff] }
 0x65e   : > { %v7028_v19 = vadd.f32 %v5184_v38, %v3683_v2  ;;  %v7031_v37 = vadd.f32 %v5185_v55, %v3684_v22  ;;  %v7034_v46 = vadd.f32 %v5186_v50, %v3685_v24  ;;  %v7037_v51 = vadd.f32 %v5187_v62, %v3686_v4  ;;  %v5190_v42 = vld [vmem:[%s5460_s19 + $0xf0] sm:$0xff]  ;;  %s7067_s19 = scalar_lea.vmem [#allocation5], %s3883_s23  ;;  %s4118_s23 = sshll.u32 %s5371_s13, 12 }
 0x65f   : > { %v7040_v6 = vadd.f32 %v5188_v14, %v3687_v47  ;;  %v7043_v21 = vadd.f32 %v5189_v0, %v3688_v1  ;;  %v7047_v2 = vadd.f32 %v5190_v42, %v6950_v39  ;;  %v7051_v22 = vadd.f32 %v5191_v12, %v6953_v36  ;;  %s3802_s20 = sshll.u32 %s7067_s19, 4  ;;  %s7110_s24 = scalar_lea.hbm %s7181_s9, %s4118_s23  ;;  %s7112_s20 = int_to_ptr.vmem [resolvable:$true] %s3802_s20 }
 0x660   : > { %v3723_v24 = vmax.f32 %v6956_v28, 0.0  ;;  %v3724_v4 = vmax.f32 %v6959_v5, 0.0  ;;  %v3725_v58 = vmax.f32 %v6962_v10, 0.0  ;;  %v3726_v47 = vmax.f32 %v6965_v54, 0.0  ;;  %s5222_s14 = scalar_lea.vmem %s7112_s20, 4096  ;;  %p5229_p8 = scmp.lt.s32.totalorder %s7112_s20, %s5227_s17 }
 0x661   : > { %v3727_v1 = vmax.f32 %v6968_v61, 0.0  ;;  %v3728_v49 = vmax.f32 %v6971_v31, 0.0  ;;  %v3729_v40 = vmax.f32 %v6974_v7, 0.0  ;;  %v3730_v39 = vmax.f32 %v6977_v25, 0.0  ;;  %p5223_p6 = scmp.ne.s32.totalorder %s7112_s20, %s5222_s14  ;;  %p5230_p10 = scmp.lt.s32.totalorder %s5228_s27, %s5222_s14 }
 0x662   : > { %v3731_v20 = vmax.f32 %v6980_v18, 0.0  ;;  %v3732_v36 = vmax.f32 %v6983_v30, 0.0  ;;  %v3733_v28 = vmax.f32 %v6986_v33, 0.0  ;;  %v3734_v5 = vmax.f32 %v6989_v15, 0.0  ;;  %3755 = vst [vmem:[%s7067_s19] sm:$0xff] %v3723_v24  ;;  %3756 = vst [vmem:[%s7067_s19 + $0x8] sm:$0xff] %v3724_v4 }
 0x663   : > { %3757 = vst [vmem:[%s7067_s19 + $0x10] sm:$0xff] %v3725_v58  ;;  %3758 = vst [vmem:[%s7067_s19 + $0x18] sm:$0xff] %v3726_v47  ;;  %v3735_v10 = vmax.f32 %v6992_v48, 0.0  ;;  %v3736_v54 = vmax.f32 %v6995_v16, 0.0  ;;  %v3737_v61 = vmax.f32 %v6998_v11, 0.0  ;;  %v3738_v31 = vmax.f32 %v7001_v34, 0.0  ;;  %p5224_p12 = pnand %p5223_p6, %p7426_p11  ;;  %p5231_p0 = por %p5230_p10, %p5229_p8 }
 0x664   : > { %3759 = vst [vmem:[%s7067_s19 + $0x20] sm:$0xff] %v3727_v1  ;;  %3760 = vst [vmem:[%s7067_s19 + $0x28] sm:$0xff] %v3728_v49  ;;  %v3739_v7 = vmax.f32 %v7004_v53, 0.0  ;;  %v3740_v25 = vmax.f32 %v7007_v35, 0.0  ;;  %v3741_v18 = vmax.f32 %v7010_v3, 0.0  ;;  %v3742_v30 = vmax.f32 %v7013_v17, 0.0 }
 0x665   : > { %3761 = vst [vmem:[%s7067_s19 + $0x30] sm:$0xff] %v3729_v40  ;;  %3762 = vst [vmem:[%s7067_s19 + $0x38] sm:$0xff] %v3730_v39  ;;  %v3743_v57 = vmax.f32 %v7016_v23, 0.0  ;;  %v3744_v33 = vmax.f32 %v7019_v9, 0.0  ;;  %v3745_v59 = vmax.f32 %v7022_v52, 0.0  ;;  %v3746_v15 = vmax.f32 %v7025_v63, 0.0  ;;  %p5225_p13 = pneg %p5224_p12 }
 0x666   : > { %3763 = vst [vmem:[%s7067_s19 + $0x40] sm:$0xff] %v3731_v20  ;;  %3764 = vst [vmem:[%s7067_s19 + $0x48] sm:$0xff] %v3732_v36  ;;  %v3747_v60 = vmax.f32 %v7028_v19, 0.0  ;;  %v3748_v48 = vmax.f32 %v7031_v37, 0.0  ;;  %v3749_v41 = vmax.f32 %v7034_v46, 0.0  ;;  %v3750_v16 = vmax.f32 %v7037_v51, 0.0 }
 0x667   : > { %3765 = vst [vmem:[%s7067_s19 + $0x50] sm:$0xff] %v3733_v28  ;;  %3766 = vst [vmem:[%s7067_s19 + $0x58] sm:$0xff] %v3734_v5  ;;  %v3751_v45 = vmax.f32 %v7040_v6, 0.0  ;;  %v3752_v11 = vmax.f32 %v7043_v21, 0.0  ;;  %v3753_v43 = vmax.f32 %v7047_v2, 0.0  ;;  %v3754_v34 = vmax.f32 %v7051_v22, 0.0  ;;  %p5232_p2 = pnand %p5231_p0, %p5225_p13 }
 0x668   : > { %3767 = vst [vmem:[%s7067_s19 + $0x60] sm:$0xff] %v3735_v10  ;;  %3768 = vst [vmem:[%s7067_s19 + $0x68] sm:$0xff] %v3736_v54 }
 0x669   : > { %3769 = vst [vmem:[%s7067_s19 + $0x70] sm:$0xff] %v3737_v61  ;;  %3770 = vst [vmem:[%s7067_s19 + $0x78] sm:$0xff] %v3738_v31 }
 0x66a   : > { %3771 = vst [vmem:[%s7067_s19 + $0x80] sm:$0xff] %v3739_v7  ;;  %3772 = vst [vmem:[%s7067_s19 + $0x88] sm:$0xff] %v3740_v25 }
 0x66b   : > { %3773 = vst [vmem:[%s7067_s19 + $0x90] sm:$0xff] %v3741_v18  ;;  %3774 = vst [vmem:[%s7067_s19 + $0x98] sm:$0xff] %v3742_v30 }
 0x66c   : > { %3775 = vst [vmem:[%s7067_s19 + $0xa0] sm:$0xff] %v3743_v57  ;;  %3776 = vst [vmem:[%s7067_s19 + $0xa8] sm:$0xff] %v3744_v33 }
 0x66d   : > { %3777 = vst [vmem:[%s7067_s19 + $0xb0] sm:$0xff] %v3745_v59  ;;  %3778 = vst [vmem:[%s7067_s19 + $0xb8] sm:$0xff] %v3746_v15 }
 0x66e   : > { %3779 = vst [vmem:[%s7067_s19 + $0xc0] sm:$0xff] %v3747_v60  ;;  %3780 = vst [vmem:[%s7067_s19 + $0xc8] sm:$0xff] %v3748_v48 }
 0x66f   : > { %3781 = vst [vmem:[%s7067_s19 + $0xd0] sm:$0xff] %v3749_v41  ;;  %3782 = vst [vmem:[%s7067_s19 + $0xd8] sm:$0xff] %v3750_v16 }
 0x670   : > { %3783 = vst [vmem:[%s7067_s19 + $0xe0] sm:$0xff] %v3751_v45  ;;  %3784 = vst [vmem:[%s7067_s19 + $0xe8] sm:$0xff] %v3752_v11 }
 0x671   : > { %3785 = vst [vmem:[%s7067_s19 + $0xf0] sm:$0xff] %v3753_v43  ;;  %3786 = vst [vmem:[%s7067_s19 + $0xf8] sm:$0xff] %v3754_v34 }
 0x672   : > { %5235 = shalt.err (!%p5232_p2)
}
 0x673   : > { %s5236_s26 = scalar_lea.hbm %s7110_s24, 4096  ;;  %s5240_s13 = scalar_lea.hbm %s7181_s9, 8192 }
 0x674   : > { %p5237_p4 = scmp.ne.s32.totalorder %s7110_s24, %s5236_s26  ;;  %p5241_p9 = scmp.lt.u32.totalorder %s7110_s24, %s7181_s9 }
 0x675   : > { %p5242_p1 = scmp.lt.u32.totalorder %s5240_s13, %s5236_s26  ;;  %p5244_p6 = scmp.lt.u32.totalorder %s5236_s26, %s7110_s24 }
 0x676   : > { %p5238_p5 = pnand %p5237_p4, %p7426_p11 }
 0x677   : > { %p5243_p3 = por %p5242_p1, %p5241_p9 }
 0x678   : > { %p5239_p7 = pneg %p5238_p5 }
 0x679   : > { %p5245_p12 = por %p5244_p6, %p5243_p3 }
 0x67b   : > { %p5246_p13 = pnand %p5245_p12, %p5239_p7 }
 0x67d   : > { %5249 = shalt.err (!%p5246_p13)
}
 0x67e   : > { %s5298_s14 = smov 128   ;;  %s5299_s17 = smov 8  }
 0x67f   : > { %5076 = dma.vmem_to_hbm [thread:$0]  (%p7426_p11), %s7112_s20, 4096, %s7110_s24, %s3788_s28, %s5298_s14, %s5298_s14, %s5299_s17  }
 0x680 PF: > { %s3817_s27 = sand.u32 1, %s5276_s30   ;;  %p7427_p8 = scmp.ne.s32.totalorder %s7253_s22, 0 }
 0x681   : > { %p7428_p10 = scmp.ge.s32.totalorder %s5288_s12, 2  ;;  %s3818_s26 = scalar_lea.sflag [#allocation4], %s3817_s27 }
 0x683   : > { %p5083_p0 = pnand %p7428_p10, %p7427_p8 }
 0x685   : > { %5271 = dma.done.wait (!%p5083_p0), %s3818_s26, 4096  }
 0x686   : > { %5273 = vsyncadd (!%p5083_p0), %s3818_s26, 4294963200  ;;  %p22_p2 = scmp.ge.s32.totalorder %s5375_s15, 4   ;;  %s7429_s30 = smov %s5280_s10 }
 0x687   : > { %s7430_s10 = smov %s5284_s11  ;;  %s7431_s11 = smov %s5387_s18 }
 0x688   : > { %s7432_s12 = smov %s5375_s15  ;;  %24 = sbr.rel (!%p22_p2) target bundleno = 5 (0x5), region = 109 }
 0x68f   :  { %3823 = vsyncpa [#allocation3], 1 }
 0x690   :  { %3825 = vsyncpa [#allocation3 + $0x1], 1 }
 0x691   :  { %3826 = vsyncpa [#allocation4], 1 }
 0x692   :  { %3828 = vsyncpa [#allocation4 + $0x1], 1 }

</bundles_post_ra>
